<compile_context>
chip_gen: v5e
topology: v5e:2x2
jax: 0.10.0
libtpu: 0.0.40
codegen_flags: <defaults>
</compile_context>

<pallas_src>
import functools

import jax
import jax.numpy as jnp
from jax import lax
from jax.experimental import pallas as pl
from jax.experimental.pallas import tpu as pltpu

LN_EPS = 1e-5  # PyTorch nn.LayerNorm default


def _layernorm_relu(h, gamma, beta):
    # Single-pass statistics (E[x], E[x^2]); all LayerNorm math in f32.
    mu = jnp.mean(h, axis=-1, keepdims=True)
    ms = jnp.mean(h * h, axis=-1, keepdims=True)
    var = ms - mu * mu
    y = (h - mu) * lax.rsqrt(var + LN_EPS) * gamma + beta
    return jnp.maximum(y, 0.0)


def critic_kernel(s_ref, a_ref, w1s_ref, w1a_ref, vec1_ref, w2_ref, vec2_ref,
                  bq_ref, q_ref, *, matmul_dtype):
    s = s_ref[...].astype(matmul_dtype)
    a = a_ref[...].astype(matmul_dtype)

    # fc1 with the concat fused as a split matmul: cat(s,a) @ W1 == s@W1s + a@W1a.
    # Weights arrive already in matmul_dtype (pre-cast in the wrapper).
    h1 = (jnp.dot(s, w1s_ref[...], preferred_element_type=jnp.float32)
          + jnp.dot(a, w1a_ref[...], preferred_element_type=jnp.float32)
          + vec1_ref[0:1, :])                                   # + b1
    h1 = _layernorm_relu(h1, vec1_ref[1:2, :], vec1_ref[2:3, :])

    # fc2 + LayerNorm + ReLU.
    h2 = (jnp.dot(h1.astype(matmul_dtype), w2_ref[...],
                  preferred_element_type=jnp.float32)
          + vec2_ref[0:1, :])                                   # + b2
    h2 = _layernorm_relu(h2, vec2_ref[1:2, :], vec2_ref[2:3, :])

    # q head (out_features = 1): VPU multiply + lane reduction into a (TB, 1)
    # column. Avoids the XLU transpose of the whole (TB, fc2) tile that a
    # batch-on-lane (1, TB) head layout would require. Kept in f32.
    q = jnp.sum(h2 * vec2_ref[3:4, :], axis=-1, keepdims=True)
    q_ref[...] = q + bq_ref[0, 0]


def _choose_block_b(B, block_b):
    if block_b is None:
        block_b = 2048          # per-row work is tiny -> amortize per-step overhead
    block_b = max(128, (block_b // 128) * 128)
    if B >= 256:
        # Guarantee >= 2 batch tiles so dimension_semantics=("parallel",) can shard
        # the grid across v7x's two TensorCores.
        block_b = min(block_b, max(128, ((B // 2) // 128) * 128))
    if block_b >= B:
        block_b = B             # single full-extent tile for small batches
    return block_b


def critic_forward(state, action, params, *, block_b=None,
                   matmul_dtype=jnp.bfloat16):
    """Forward pass of CriticNetwork. Returns q of shape (B, 1), f32."""
    B, sd = state.shape
    _, ad = action.shape
    fc1 = params["w1s"].shape[1]
    fc2 = params["w2"].shape[1]

    block_b = _choose_block_b(B, block_b)
    n_tiles = pl.cdiv(B, block_b)
    B_pad = n_tiles * block_b
    if B_pad != B:
        # Zero-pad the tail tile so LayerNorm only ever sees well-defined values.
        state = jnp.pad(state, ((0, B_pad - B), (0, 0)))
        action = jnp.pad(action, ((0, B_pad - B), (0, 0)))

    # Pre-cast resident matmul weights in the wrapper (weights stay in VMEM across
    # grid steps; an in-kernel cast would repack them every step) and pack the small
    # per-feature vectors into two arrays to cut DMA streams / BlockSpec bookkeeping.
    w1s = params["w1s"].astype(matmul_dtype)
    w1a = params["w1a"].astype(matmul_dtype)
    w2 = params["w2"].astype(matmul_dtype)
    vec1 = jnp.concatenate([params["b1"], params["g1"], params["be1"]], axis=0)   # (3, fc1)
    vec2 = jnp.concatenate([params["b2"], params["g2"], params["be2"],
                            params["wq"]], axis=0)                                # (4, fc2)
    bq = params["bq"]                                                             # (1, 1) -> SMEM

    row_map = lambda i: (i, 0)      # batch-tiled arrays
    const_map = lambda i: (0, 0)    # weights: same block every step -> stay resident

    in_specs = [
        pl.BlockSpec((block_b, sd), row_map),
        pl.BlockSpec((block_b, ad), row_map),
        pl.BlockSpec((sd, fc1), const_map),
        pl.BlockSpec((ad, fc1), const_map),
        pl.BlockSpec((3, fc1), const_map),
        pl.BlockSpec((fc1, fc2), const_map),
        pl.BlockSpec((4, fc2), const_map),
        pl.BlockSpec(memory_space=pltpu.MemorySpace.SMEM),   # bq scalar
    ]
    out_specs = pl.BlockSpec((block_b, 1), row_map)

    # Advisory cost estimate for the XLA scheduler.
    w_item = jnp.dtype(matmul_dtype).itemsize
    flops = 2 * B_pad * ((sd + ad) * fc1 + fc1 * fc2 + fc2)
    bytes_accessed = (4 * B_pad * (sd + ad + 1)
                      + w_item * ((sd + ad) * fc1 + fc1 * fc2)
                      + 4 * (3 * fc1 + 4 * fc2 + 1))
    cost = pl.CostEstimate(flops=flops, transcendentals=2 * B_pad,
                           bytes_accessed=bytes_accessed)

    # VMEM budget: double-buffered I/O tiles + resident weights (counted as if
    # double-buffered, to be safe) + f32 activation temporaries, x2 headroom,
    # capped well under v7x's 64 MiB per TensorCore.
    vmem_bytes = (2 * 4 * block_b * (sd + ad + 1)
                  + 2 * w_item * ((sd + ad) * fc1 + fc1 * fc2)
                  + 2 * 4 * (3 * fc1 + 4 * fc2)
                  + 2 * 4 * block_b * (fc1 + fc2))
    vmem_limit = int(min(max(2 * vmem_bytes, 16 << 20), 40 << 20))

    kernel = functools.partial(critic_kernel, matmul_dtype=matmul_dtype)

    q = pl.pallas_call(
        kernel,
        out_shape=jax.ShapeDtypeStruct((B_pad, 1), jnp.float32),
        grid=(n_tiles,),
        in_specs=in_specs,
        out_specs=out_specs,
        compiler_params=pltpu.CompilerParams(
            dimension_semantics=("parallel",),   # shard batch tiles across TCs (v7x)
            vmem_limit_bytes=vmem_limit),
        cost_estimate=cost,
    )(state, action, w1s, w1a, vec1, w2, vec2, bq)

    return q[:B] if B_pad != B else q


def init_params(key, state_dim, action_dim, fc1_dim, fc2_dim):
    """Deterministic init mimicking PyTorch nn.Linear (uniform +-1/sqrt(fan_in))."""
    ks = jax.random.split(key, 3)
    in1 = state_dim + action_dim

    def lin(k, fan_in, fan_out):
        bound = 1.0 / (fan_in ** 0.5)
        kw, kb = jax.random.split(k)
        w = jax.random.uniform(kw, (fan_in, fan_out), jnp.float32, -bound, bound)
        b = jax.random.uniform(kb, (1, fan_out), jnp.float32, -bound, bound)
        return w, b

    w1, b1 = lin(ks[0], in1, fc1_dim)
    w2, b2 = lin(ks[1], fc1_dim, fc2_dim)
    wq_col, bq = lin(ks[2], fc2_dim, 1)

    return {
        # fc1 weight split so the kernel can fuse the state/action concat.
        "w1s": w1[:state_dim], "w1a": w1[state_dim:], "b1": b1,
        "g1": jnp.ones((1, fc1_dim), jnp.float32),
        "be1": jnp.zeros((1, fc1_dim), jnp.float32),
        "w2": w2, "b2": b2,
        "g2": jnp.ones((1, fc2_dim), jnp.float32),
        "be2": jnp.zeros((1, fc2_dim), jnp.float32),
        "wq": wq_col.T,   # (1, fc2) row for the in-kernel lane reduction
        "bq": bq,         # (1, 1)
    }


def _layernorm_ref(h, gamma, beta):
    mu = jnp.mean(h, axis=-1, keepdims=True)
    var = jnp.mean((h - mu) * (h - mu), axis=-1, keepdims=True)
    return (h - mu) * lax.rsqrt(var + LN_EPS) * gamma + beta


def critic_reference(state, action, p):
    """Pure-JAX reference mirroring the PyTorch forward exactly."""
    x = jnp.concatenate([state, action], axis=-1)
    w1 = jnp.concatenate([p["w1s"], p["w1a"]], axis=0)
    h = x @ w1 + p["b1"]
    h = jax.nn.relu(_layernorm_ref(h, p["g1"], p["be1"]))
    h = h @ p["w2"] + p["b2"]
    h = jax.nn.relu(_layernorm_ref(h, p["g2"], p["be2"]))
    return h @ p["wq"].T + p["bq"]


# TODO(synk): the Adam optimizer and save/load_checkpoint methods are training/IO
# utilities with no kernel equivalent; only forward() is implemented here.

if __name__ == "__main__":
    # fc dims chosen as 128 for full 128-lane vreg / MXU utilization; batch of 256
    # splits into two 128-row tiles (>= 2 grid steps so v7x megacore is exercised).
    B, state_dim, action_dim, fc1_dim, fc2_dim = 256, 24, 8, 128, 128

    key = jax.random.PRNGKey(0)
    k_s, k_a, k_p = jax.random.split(key, 3)
    state = jax.random.normal(k_s, (B, state_dim), jnp.float32)
    action = jax.random.normal(k_a, (B, action_dim), jnp.float32)
    params = init_params(k_p, state_dim, action_dim, fc1_dim, fc2_dim)

    q_ref = critic_reference(state, action, params)

    # Default path: bf16 MXU operands, f32 accumulation / LayerNorm (all generations).
    q_bf16 = jax.block_until_ready(critic_forward(state, action, params))
    assert q_bf16.shape == (B, 1)
    assert jnp.allclose(q_bf16, q_ref, atol=5e-2, rtol=5e-2), (q_bf16[:4], q_ref[:4])

    # f32 path: tight numerical check of the kernel math itself.
    q_f32 = jax.block_until_ready(
        critic_forward(state, action, params, matmul_dtype=jnp.float32))
    assert jnp.allclose(q_f32, q_ref, atol=1e-3, rtol=1e-3), (q_f32[:4], q_ref[:4])

    # Odd batch size: single full-extent tile (block == full dims), no 128 multiple.
    q_odd = jax.block_until_ready(critic_forward(state[:200], action[:200], params))
    assert q_odd.shape == (200, 1)
    assert jnp.allclose(q_odd, q_ref[:200], atol=5e-2, rtol=5e-2)

    print("KERNEL_OK")
</pallas_src>

<mosaic_0001>
module attributes {stable_mosaic.version = 11 : i64} {
  func.func @critic_kernel(%arg0: i32, %arg1: memref<128x24xf32, #tpu.memory_space<vmem>>, %arg2: memref<128x8xf32, #tpu.memory_space<vmem>>, %arg3: memref<24x128xbf16, #tpu.memory_space<vmem>>, %arg4: memref<8x128xbf16, #tpu.memory_space<vmem>>, %arg5: memref<3x128xf32, #tpu.memory_space<vmem>>, %arg6: memref<128x128xbf16, #tpu.memory_space<vmem>>, %arg7: memref<4x128xf32, #tpu.memory_space<vmem>>, %arg8: memref<1x1xf32, #tpu.memory_space<smem>>, %arg9: memref<128x1xf32, #tpu.memory_space<vmem>>) attributes {dimension_semantics = [#tpu.dimension_semantics<parallel>], iteration_bounds = array<i64: 2>, scalar_prefetch = 0 : i64, scratch_operands = 0 : i64, tpu.core_type = #tpu.core_type<tc>, window_params = [{transform_indices = @transform_0, window_bounds = array<i64: 128, 24>}, {transform_indices = @transform_1, window_bounds = array<i64: 128, 8>}, {pipeline_mode = #tpu.pipeline_mode<synchronous>, transform_indices = @transform_2, window_bounds = array<i64: 24, 128>}, {pipeline_mode = #tpu.pipeline_mode<synchronous>, transform_indices = @transform_3, window_bounds = array<i64: 8, 128>}, {pipeline_mode = #tpu.pipeline_mode<synchronous>, transform_indices = @transform_4, window_bounds = array<i64: 3, 128>}, {pipeline_mode = #tpu.pipeline_mode<synchronous>, transform_indices = @transform_5, window_bounds = array<i64: 128, 128>}, {pipeline_mode = #tpu.pipeline_mode<synchronous>, transform_indices = @transform_6, window_bounds = array<i64: 4, 128>}, {transform_indices = @transform_7, window_bounds = array<i64: 1, 1>}, {transform_indices = @transform_8, window_bounds = array<i64: 128, 1>}]} {
    %c0 = arith.constant 0 : index
    %c0_0 = arith.constant 0 : index
    %0 = vector.load %arg1[%c0, %c0_0] : memref<128x24xf32, #tpu.memory_space<vmem>>, vector<128x24xf32>
    %1 = arith.truncf %0 : vector<128x24xf32> to vector<128x24xbf16>
    %c0_1 = arith.constant 0 : index
    %c0_2 = arith.constant 0 : index
    %2 = vector.load %arg2[%c0_1, %c0_2] : memref<128x8xf32, #tpu.memory_space<vmem>>, vector<128x8xf32>
    %3 = arith.truncf %2 : vector<128x8xf32> to vector<128x8xbf16>
    %c0_3 = arith.constant 0 : index
    %c0_4 = arith.constant 0 : index
    %4 = vector.load %arg3[%c0_3, %c0_4] : memref<24x128xbf16, #tpu.memory_space<vmem>>, vector<24x128xbf16>
    %cst = arith.constant dense<0.000000e+00> : vector<128x128xf32>
    %5 = tpu.matmul %1, %4, %cst {dimension_numbers = #tpu.dot_dimension_numbers<[1], [0], [0], [1], [0, 0, 1, 1], [], []>} : vector<128x24xbf16>, vector<24x128xbf16>, vector<128x128xf32> -> vector<128x128xf32>
    %c0_5 = arith.constant 0 : index
    %c0_6 = arith.constant 0 : index
    %6 = vector.load %arg4[%c0_5, %c0_6] : memref<8x128xbf16, #tpu.memory_space<vmem>>, vector<8x128xbf16>
    %cst_7 = arith.constant dense<0.000000e+00> : vector<128x128xf32>
    %7 = tpu.matmul %3, %6, %cst_7 {dimension_numbers = #tpu.dot_dimension_numbers<[1], [0], [0], [1], [0, 0, 1, 1], [], []>} : vector<128x8xbf16>, vector<8x128xbf16>, vector<128x128xf32> -> vector<128x128xf32>
    %8 = arith.addf %5, %7 : vector<128x128xf32>
    %c0_8 = arith.constant 0 : index
    %c0_9 = arith.constant 0 : index
    %9 = vector.load %arg5[%c0_8, %c0_9] : memref<3x128xf32, #tpu.memory_space<vmem>>, vector<1x128xf32>
    %10 = vector.broadcast %9 : vector<1x128xf32> to vector<128x128xf32>
    %11 = arith.addf %8, %10 : vector<128x128xf32>
    %c1 = arith.constant 1 : index
    %c0_10 = arith.constant 0 : index
    %12 = vector.load %arg5[%c1, %c0_10] : memref<3x128xf32, #tpu.memory_space<vmem>>, vector<1x128xf32>
    %c2 = arith.constant 2 : index
    %c0_11 = arith.constant 0 : index
    %13 = vector.load %arg5[%c2, %c0_11] : memref<3x128xf32, #tpu.memory_space<vmem>>, vector<1x128xf32>
    %cst_12 = arith.constant dense<0.000000e+00> : vector<128xf32>
    %14 = vector.multi_reduction <add>, %11, %cst_12 [1] : vector<128x128xf32> to vector<128xf32>
    %15 = vector.shape_cast %14 : vector<128xf32> to vector<128x1xf32>
    %cst_13 = arith.constant 1.280000e+02 : f32
    %16 = vector.broadcast %cst_13 : f32 to vector<128x1xf32>
    %17 = arith.divf %15, %16 : vector<128x1xf32>
    %18 = arith.mulf %11, %11 : vector<128x128xf32>
    %cst_14 = arith.constant dense<0.000000e+00> : vector<128xf32>
    %19 = vector.multi_reduction <add>, %18, %cst_14 [1] : vector<128x128xf32> to vector<128xf32>
    %20 = vector.shape_cast %19 : vector<128xf32> to vector<128x1xf32>
    %cst_15 = arith.constant 1.280000e+02 : f32
    %21 = vector.broadcast %cst_15 : f32 to vector<128x1xf32>
    %22 = arith.divf %20, %21 : vector<128x1xf32>
    %23 = arith.mulf %17, %17 : vector<128x1xf32>
    %24 = arith.subf %22, %23 : vector<128x1xf32>
    %25 = vector.broadcast %17 : vector<128x1xf32> to vector<128x128xf32>
    %26 = arith.subf %11, %25 : vector<128x128xf32>
    %cst_16 = arith.constant 9.99999974E-6 : f32
    %27 = vector.broadcast %cst_16 : f32 to vector<128x1xf32>
    %28 = arith.addf %24, %27 : vector<128x1xf32>
    %29 = math.rsqrt %28 : vector<128x1xf32>
    %30 = vector.broadcast %29 : vector<128x1xf32> to vector<128x128xf32>
    %31 = arith.mulf %26, %30 : vector<128x128xf32>
    %32 = vector.broadcast %12 : vector<1x128xf32> to vector<128x128xf32>
    %33 = arith.mulf %31, %32 : vector<128x128xf32>
    %34 = vector.broadcast %13 : vector<1x128xf32> to vector<128x128xf32>
    %35 = arith.addf %33, %34 : vector<128x128xf32>
    %cst_17 = arith.constant 0.000000e+00 : f32
    %36 = vector.broadcast %cst_17 : f32 to vector<128x128xf32>
    %37 = arith.maximumf %35, %36 : vector<128x128xf32>
    %38 = arith.truncf %37 : vector<128x128xf32> to vector<128x128xbf16>
    %c0_18 = arith.constant 0 : index
    %c0_19 = arith.constant 0 : index
    %39 = vector.load %arg6[%c0_18, %c0_19] : memref<128x128xbf16, #tpu.memory_space<vmem>>, vector<128x128xbf16>
    %cst_20 = arith.constant dense<0.000000e+00> : vector<128x128xf32>
    %40 = tpu.matmul %38, %39, %cst_20 {dimension_numbers = #tpu.dot_dimension_numbers<[1], [0], [0], [1], [0, 0, 1, 1], [], []>} : vector<128x128xbf16>, vector<128x128xbf16>, vector<128x128xf32> -> vector<128x128xf32>
    %c0_21 = arith.constant 0 : index
    %c0_22 = arith.constant 0 : index
    %41 = vector.load %arg7[%c0_21, %c0_22] : memref<4x128xf32, #tpu.memory_space<vmem>>, vector<1x128xf32>
    %42 = vector.broadcast %41 : vector<1x128xf32> to vector<128x128xf32>
    %43 = arith.addf %40, %42 : vector<128x128xf32>
    %c1_23 = arith.constant 1 : index
    %c0_24 = arith.constant 0 : index
    %44 = vector.load %arg7[%c1_23, %c0_24] : memref<4x128xf32, #tpu.memory_space<vmem>>, vector<1x128xf32>
    %c2_25 = arith.constant 2 : index
    %c0_26 = arith.constant 0 : index
    %45 = vector.load %arg7[%c2_25, %c0_26] : memref<4x128xf32, #tpu.memory_space<vmem>>, vector<1x128xf32>
    %cst_27 = arith.constant dense<0.000000e+00> : vector<128xf32>
    %46 = vector.multi_reduction <add>, %43, %cst_27 [1] : vector<128x128xf32> to vector<128xf32>
    %47 = vector.shape_cast %46 : vector<128xf32> to vector<128x1xf32>
    %cst_28 = arith.constant 1.280000e+02 : f32
    %48 = vector.broadcast %cst_28 : f32 to vector<128x1xf32>
    %49 = arith.divf %47, %48 : vector<128x1xf32>
    %50 = arith.mulf %43, %43 : vector<128x128xf32>
    %cst_29 = arith.constant dense<0.000000e+00> : vector<128xf32>
    %51 = vector.multi_reduction <add>, %50, %cst_29 [1] : vector<128x128xf32> to vector<128xf32>
    %52 = vector.shape_cast %51 : vector<128xf32> to vector<128x1xf32>
    %cst_30 = arith.constant 1.280000e+02 : f32
    %53 = vector.broadcast %cst_30 : f32 to vector<128x1xf32>
    %54 = arith.divf %52, %53 : vector<128x1xf32>
    %55 = arith.mulf %49, %49 : vector<128x1xf32>
    %56 = arith.subf %54, %55 : vector<128x1xf32>
    %57 = vector.broadcast %49 : vector<128x1xf32> to vector<128x128xf32>
    %58 = arith.subf %43, %57 : vector<128x128xf32>
    %cst_31 = arith.constant 9.99999974E-6 : f32
    %59 = vector.broadcast %cst_31 : f32 to vector<128x1xf32>
    %60 = arith.addf %56, %59 : vector<128x1xf32>
    %61 = math.rsqrt %60 : vector<128x1xf32>
    %62 = vector.broadcast %61 : vector<128x1xf32> to vector<128x128xf32>
    %63 = arith.mulf %58, %62 : vector<128x128xf32>
    %64 = vector.broadcast %44 : vector<1x128xf32> to vector<128x128xf32>
    %65 = arith.mulf %63, %64 : vector<128x128xf32>
    %66 = vector.broadcast %45 : vector<1x128xf32> to vector<128x128xf32>
    %67 = arith.addf %65, %66 : vector<128x128xf32>
    %cst_32 = arith.constant 0.000000e+00 : f32
    %68 = vector.broadcast %cst_32 : f32 to vector<128x128xf32>
    %69 = arith.maximumf %67, %68 : vector<128x128xf32>
    %c3 = arith.constant 3 : index
    %c0_33 = arith.constant 0 : index
    %70 = vector.load %arg7[%c3, %c0_33] : memref<4x128xf32, #tpu.memory_space<vmem>>, vector<1x128xf32>
    %71 = vector.broadcast %70 : vector<1x128xf32> to vector<128x128xf32>
    %72 = arith.mulf %69, %71 : vector<128x128xf32>
    %cst_34 = arith.constant dense<0.000000e+00> : vector<128xf32>
    %73 = vector.multi_reduction <add>, %72, %cst_34 [1] : vector<128x128xf32> to vector<128xf32>
    %74 = vector.shape_cast %73 : vector<128xf32> to vector<128x1xf32>
    %c0_35 = arith.constant 0 : index
    %c0_36 = arith.constant 0 : index
    %75 = memref.load %arg8[%c0_35, %c0_36] : memref<1x1xf32, #tpu.memory_space<smem>>
    %76 = vector.broadcast %75 : f32 to vector<128x1xf32>
    %77 = arith.addf %74, %76 : vector<128x1xf32>
    %c0_37 = arith.constant 0 : index
    %c0_38 = arith.constant 0 : index
    %78 = vector.load %arg9[%c0_37, %c0_38] : memref<128x1xf32, #tpu.memory_space<vmem>>, vector<128x1xf32>
    tpu.vector_store %arg9[%c0_37, %c0_38], %77 {strides = array<i32>} : memref<128x1xf32, #tpu.memory_space<vmem>>, vector<128x1xf32>,
    return
  }
  func.func @transform_0(%arg0: i32) -> (i32, i32) {
    %c0_i32 = arith.constant 0 : i32
    %c0_i32_0 = arith.constant 0 : i32
    return %arg0, %c0_i32 : i32, i32
  }
  func.func @transform_1(%arg0: i32) -> (i32, i32) {
    %c0_i32 = arith.constant 0 : i32
    %c0_i32_0 = arith.constant 0 : i32
    return %arg0, %c0_i32 : i32, i32
  }
  func.func @transform_2(%arg0: i32) -> (i32, i32) {
    %c0_i32 = arith.constant 0 : i32
    %c0_i32_0 = arith.constant 0 : i32
    %c0_i32_1 = arith.constant 0 : i32
    return %c0_i32, %c0_i32_0 : i32, i32
  }
  func.func @transform_3(%arg0: i32) -> (i32, i32) {
    %c0_i32 = arith.constant 0 : i32
    %c0_i32_0 = arith.constant 0 : i32
    %c0_i32_1 = arith.constant 0 : i32
    return %c0_i32, %c0_i32_0 : i32, i32
  }
  func.func @transform_4(%arg0: i32) -> (i32, i32) {
    %c0_i32 = arith.constant 0 : i32
    %c0_i32_0 = arith.constant 0 : i32
    %c0_i32_1 = arith.constant 0 : i32
    return %c0_i32, %c0_i32_0 : i32, i32
  }
  func.func @transform_5(%arg0: i32) -> (i32, i32) {
    %c0_i32 = arith.constant 0 : i32
    %c0_i32_0 = arith.constant 0 : i32
    %c0_i32_1 = arith.constant 0 : i32
    return %c0_i32, %c0_i32_0 : i32, i32
  }
  func.func @transform_6(%arg0: i32) -> (i32, i32) {
    %c0_i32 = arith.constant 0 : i32
    %c0_i32_0 = arith.constant 0 : i32
    %c0_i32_1 = arith.constant 0 : i32
    return %c0_i32, %c0_i32_0 : i32, i32
  }
  func.func @transform_7(%arg0: i32) -> (i32, i32) {
    %c0_i32 = arith.constant 0 : i32
    %c0_i32_0 = arith.constant 0 : i32
    %c0_i32_1 = arith.constant 0 : i32
    return %c0_i32, %c0_i32_0 : i32, i32
  }
  func.func @transform_8(%arg0: i32) -> (i32, i32) {
    %c0_i32 = arith.constant 0 : i32
    %c0_i32_0 = arith.constant 0 : i32
    return %arg0, %c0_i32 : i32, i32
  }
}

</mosaic_0001>

<bundles_post_ra>
// kernel: tpu_custom_call.1
= control target key start
LH: loop header
LB: loop body
LE: loop exit
PB: predicated region body
PF: predicated region fallthrough
CT: control target
= control target key end

     0   :  { %s1879_s29 = smov 0   ;;  %s2601_s0 = inlined_call_operand.vmem [shape: f32[256,24], index: 0, kind: input, shape index: {}]   ;;  %s2602_s1 = inlined_call_operand.vmem [shape: f32[256,8], index: 1, kind: input, shape index: {}]   ;;  %s2603_s2 = inlined_call_operand.vmem [shape: bf16[24,128], index: 2, kind: input, shape index: {}]   ;;  %s2604_s3 = inlined_call_operand.vmem [shape: bf16[8,128], index: 3, kind: input, shape index: {}]   ;;  %s2605_s4 = inlined_call_operand.vmem [shape: f32[3,128], index: 4, kind: input, shape index: {}]   ;;  %s2606_s5 = inlined_call_operand.vmem [shape: bf16[128,128], index: 5, kind: input, shape index: {}]   ;;  %s2607_s6 = inlined_call_operand.vmem [shape: f32[4,128], index: 6, kind: input, shape index: {}]   ;;  %s2608_s7 = inlined_call_operand.<no memory space> [shape: f32[1,1], index: 7, kind: input, shape index: {}]   ;;  %s2609_s8 = inlined_call_operand.vmem [shape: f32[256,1], index: 8, kind: output, shape index: {}]  }
   0x1   :  { %13 = sst [smem:[#allocation2]] %s2608_s7 }
   0x2 LB: > { %s1658_s30 = sadd.s32 4294967295, %s1828_s29   ;;  %p1662_p0 = scmp.ge.s32.totalorder %s1828_s29, 1  ;;  %s1828_s29 = sphi %s1879_s29, %s19_s29  }
   0x3   : > { %p275_p1 = scmp.lt.s32.totalorder %s1828_s29, 3 }
   0x5   : > { %p276_p2 = pnand %p1662_p0, %p275_p1 }
   0x6   : > { %s1663_s12 = sshll.u32 (!%p276_p2), %s1658_s30, 4  ;;  %s1555_s10 = sld [smem:[#allocation2]] (!%p276_p2) }
   0x7   : > { %279 = sbr.rel (%p276_p2) target bundleno = 865 (0x361), region = 52  ;;  %p315_p3 = scmp.lt.s32.totalorder (!%p276_p2), %s1663_s12, 31 }
   0xc   : > { %v383_v0 = vld [vmem:[%s2603_s2 + $0x8] sm:$0xf]  ;;  %vm410_vm0 = vcmask 1043456   ;;  %v384_v1 = vld [vmem:[%s2604_s3] sm:$0xf]  ;;  %s2611_s12 = smov (!%p315_p3, %s1663_s12), 31 }
   0xd   : > { %v468_v2 = vunpack.c.l.b16 %v383_v0  ;;  %v412_v3 = vsel %vm410_vm0, %v384_v1, 0  ;;  %s1893_s13 = sshll.u32 %s2611_s12, 3  ;;  %v1723_v6 = vld [vmem:[%s2603_s2] sm:$0xff]  ;;  %vm385_vm1 = vcmask 64512   ;;  %vm472_vm2 = vcmask 195584  }
   0xe   : > { %421 = vmatpush.bf16.msra.mxu0 %v412_v3  ;;  %s1899_s16 = scalar_lea.vmem %s2602_s1, %s1893_s13  ;;  %s1908_s21 = scalar_lea.vmem %s2601_s0, %s1893_s13  ;;  %v1961_v56 = vld [vmem:[%s2605_s4] ss:$0 sm:$0xff] }
   0xf   : > { %v470_v4 = vpack.c.b16 %v468_v2, %v468_v2  ;;  %v357_v7 = vld [vmem:[%s1899_s16] sm:$0xff]  ;;  %v358_v8 = vld [vmem:[%s1899_s16 + $0x8] sm:$0xff]  ;;  %v359_v13 = vld [vmem:[%s1899_s16 + $0x10] sm:$0xff]  ;;  %s2519_s12 = scalar_lea.vmem %s2609_s8, %s1893_s13 }
  0x10   : > { %v333_v9 = vld [vmem:[%s1908_s21] sm:$0xff]  ;;  %v373_v10 = vpack.c.bf16 %v358_v8, %v357_v7  ;;  %v334_v11 = vld [vmem:[%s1908_s21 + $0x8] sm:$0xff]  ;;  %v360_v14 = vld [vmem:[%s1899_s16 + $0x18] sm:$0xff] }
  0x11   : > { %v498_v5 = vsel %vm410_vm0, %v470_v4, 0  ;;  %v349_v12 = vpack.c.bf16 %v334_v11, %v333_v9  ;;  %v374_v15 = vpack.c.bf16 %v360_v14, %v359_v13  ;;  %v335_v16 = vld [vmem:[%s1908_s21 + $0x10] sm:$0xff]  ;;  %v336_v17 = vld [vmem:[%s1908_s21 + $0x18] sm:$0xff]  ;;  %v361_v19 = vld [vmem:[%s1899_s16 + $0x20] sm:$0xff] }
  0x12   : > { %506 = vmatpush.bf16.msra.mxu1 %v498_v5  ;;  %1669 = vmatmul.msk.bf16.vlgmr.msra.gmra.mxu0 %vm385_vm1, %v373_v10  ;;  %v350_v18 = vpack.c.bf16 %v336_v17, %v335_v16  ;;  %v362_v20 = vld [vmem:[%s1899_s16 + $0x28] sm:$0xff]  ;;  %v337_v22 = vld [vmem:[%s1908_s21 + $0x20] sm:$0xff]  ;;  %v363_v25 = vld [vmem:[%s1899_s16 + $0x30] sm:$0xff] }
  0x13   : > { %v375_v21 = vpack.c.bf16 %v362_v20, %v361_v19  ;;  %v338_v23 = vld [vmem:[%s1908_s21 + $0x28] sm:$0xff]  ;;  %v364_v26 = vld [vmem:[%s1899_s16 + $0x38] sm:$0xff]  ;;  %v339_v28 = vld [vmem:[%s1908_s21 + $0x30] sm:$0xff] }
  0x14   : > { %v351_v24 = vpack.c.bf16 %v338_v23, %v337_v22  ;;  %v376_v27 = vpack.c.bf16 %v364_v26, %v363_v25  ;;  %v340_v29 = vld [vmem:[%s1908_s21 + $0x38] sm:$0xff]  ;;  %v365_v31 = vld [vmem:[%s1899_s16 + $0x40] sm:$0xff]  ;;  %v366_v32 = vld [vmem:[%s1899_s16 + $0x48] sm:$0xff] }
  0x15   : > { %v352_v30 = vpack.c.bf16 %v340_v29, %v339_v28  ;;  %v377_v33 = vpack.c.bf16 %v366_v32, %v365_v31  ;;  %v341_v34 = vld [vmem:[%s1908_s21 + $0x40] sm:$0xff]  ;;  %v342_v35 = vld [vmem:[%s1908_s21 + $0x48] sm:$0xff]  ;;  %v367_v37 = vld [vmem:[%s1899_s16 + $0x50] sm:$0xff] }
  0x16   : > { %507 = vmatpush.bf16.msra.mxu1 %v1723_v6  ;;  %v353_v36 = vpack.c.bf16 %v342_v35, %v341_v34  ;;  %v368_v38 = vld [vmem:[%s1899_s16 + $0x58] sm:$0xff]  ;;  %v343_v40 = vld [vmem:[%s1908_s21 + $0x50] sm:$0xff]  ;;  %v369_v43 = vld [vmem:[%s1899_s16 + $0x60] sm:$0xff] }
  0x17   : > { %v378_v39 = vpack.c.bf16 %v368_v38, %v367_v37  ;;  %v344_v41 = vld [vmem:[%s1908_s21 + $0x58] sm:$0xff]  ;;  %v370_v44 = vld [vmem:[%s1899_s16 + $0x68] sm:$0xff]  ;;  %v345_v46 = vld [vmem:[%s1908_s21 + $0x60] sm:$0xff] }
  0x18   : > { %v354_v42 = vpack.c.bf16 %v344_v41, %v343_v40  ;;  %v379_v45 = vpack.c.bf16 %v370_v44, %v369_v43  ;;  %v346_v47 = vld [vmem:[%s1908_s21 + $0x68] sm:$0xff]  ;;  %v371_v49 = vld [vmem:[%s1899_s16 + $0x70] sm:$0xff]  ;;  %v372_v50 = vld [vmem:[%s1899_s16 + $0x78] sm:$0xff] }
  0x19   : > { %1681 = vmatmul.msk.bf16.vlgmr.msra.gmra.mxu1 %vm472_vm2, %v349_v12  ;;  %v355_v48 = vpack.c.bf16 %v346_v47, %v345_v46  ;;  %v380_v51 = vpack.c.bf16 %v372_v50, %v371_v49  ;;  %v347_v52 = vld [vmem:[%s1908_s21 + $0x70] sm:$0xff]  ;;  %v348_v53 = vld [vmem:[%s1908_s21 + $0x78] sm:$0xff]  ;;  %v1830_v47 = vmov 128.0  }
  0x1a   : > { %v356_v54 = vpack.c.bf16 %v348_v53, %v347_v52  ;;  %1756 = vrcp.f32 %v1830_v47  ;;  %v1731_v52 = vld [vmem:[%s2606_s5 + $0x38] sm:$0xff] }
  0x1b   : > { %1052 = vmatpush.bf16.msra.mxu2 %v1731_v52  ;;  %1732 = vmatpush.bf16.msra.mxu3 %v1731_v52 }
  0x20   : > { %v1757_v50 = vpop.eup %1756 }
  0x21   : > { %vm606_vm3 = vweird.f32 %v1757_v50 }
  0x22   : > { %1670 = vmatmul.msk.bf16.gmra.mxu0 %vm385_vm1, %v374_v15 }
  0x29   : > { %1682 = vmatmul.msk.bf16.gmra.mxu1 %vm472_vm2, %v350_v18 }
  0x32   : > { %1671 = vmatmul.msk.bf16.gmra.mxu0 %vm385_vm1, %v375_v21 }
  0x39   : > { %1683 = vmatmul.msk.bf16.gmra.mxu1 %vm472_vm2, %v351_v24 }
  0x42   : > { %1672 = vmatmul.msk.bf16.gmra.mxu0 %vm385_vm1, %v376_v27 }
  0x49   : > { %1684 = vmatmul.msk.bf16.gmra.mxu1 %vm472_vm2, %v352_v30 }
  0x52   : > { %1673 = vmatmul.msk.bf16.gmra.mxu0 %vm385_vm1, %v377_v33 }
  0x59   : > { %1685 = vmatmul.msk.bf16.gmra.mxu1 %vm472_vm2, %v353_v36 }
  0x62   : > { %1674 = vmatmul.msk.bf16.gmra.mxu0 %vm385_vm1, %v378_v39 }
  0x69   : > { %1686 = vmatmul.msk.bf16.gmra.mxu1 %vm472_vm2, %v354_v42 }
  0x72   : > { %1675 = vmatmul.msk.bf16.gmra.mxu0 %vm385_vm1, %v379_v45 }
  0x79   : > { %1687 = vmatmul.msk.bf16.gmra.mxu1 %vm472_vm2, %v355_v48 }
  0x82   : > { %1676 = vmatmul.msk.bf16.gmra.mxu0 %vm385_vm1, %v380_v51 }
  0x89   : > { %1688 = vmatmul.msk.bf16.gmra.mxu1 %vm472_vm2, %v356_v54 }
  0x8f   : > { %v423_v55 = vpop.f32.mrf.mxu0 }
  0x96   : > { %v509_v57 = vpop.f32.mrf.mxu1 }
  0x97   : > { %v510_v58 = vadd.f32 %v509_v57, %v423_v55  ;;  %v425_v60 = vpop.f32.mrf.mxu0  ;;  %v602_v55 = vmul.f32 128.0, %v1757_v50 }
  0x99   : > { %v1964_v59 = vadd.f32 %v1961_v56, %v510_v58 }
  0x9b   : > { %569 = vadd.xlane.f32.xlu0 %v1964_v59  ;;  %v624_v61 = vmul.f32 %v1964_v59, %v1964_v59 }
  0x9d   : > { %640 = vadd.xlane.f32.xlu1 %v624_v61 }
  0x9e   : > { %v511_v62 = vpop.f32.mrf.mxu1 }
  0x9f   : > { %v512_v63 = vadd.f32 %v511_v62, %v425_v60  ;;  %v428_v1 = vpop.f32.mrf.mxu0  ;;  %v1730_v60 = vld [vmem:[%s2606_s5 + $0x30] sm:$0xff]  ;;  %v603_v62 = vsub.f32 1.0, %v602_v55 }
  0xa0   : > { %1053 = vmatpush.bf16.msra.mxu2 %v1730_v60  ;;  %1733 = vmatpush.bf16.msra.mxu3 %v1730_v60 }
  0xa1   : > { %v1970_v0 = vadd.f32 %v1961_v56, %v512_v63 }
  0xa3   : > { %571 = vadd.xlane.f32.xlu0 %v1970_v0  ;;  %v625_v2 = vmul.f32 %v1970_v0, %v1970_v0 }
  0xa5   : > { %642 = vadd.xlane.f32.xlu1 %v625_v2  ;;  %v1729_v2 = vld [vmem:[%s2606_s5 + $0x28] sm:$0xff] }
  0xa6   : > { %v514_v3 = vpop.f32.mrf.mxu1  ;;  %1054 = vmatpush.bf16.msra.mxu2 %v1729_v2  ;;  %1734 = vmatpush.bf16.msra.mxu3 %v1729_v2 }
  0xa7   : > { %v515_v4 = vadd.f32 %v514_v3, %v428_v1  ;;  %v430_v6 = vpop.f32.mrf.mxu0 }
  0xa9   : > { %v1976_v5 = vadd.f32 %v1961_v56, %v515_v4 }
  0xab   : > { %573 = vadd.xlane.f32.xlu2 %v1976_v5  ;;  %v626_v7 = vmul.f32 %v1976_v5, %v1976_v5 }
  0xad   : > { %644 = vadd.xlane.f32.xlu0 %v626_v7 }
  0xae   : > { %v516_v8 = vpop.f32.mrf.mxu1 }
  0xaf   : > { %v517_v9 = vadd.f32 %v516_v8, %v430_v6  ;;  %v433_v11 = vpop.f32.mrf.mxu0  ;;  %v604_v6 = vmul.f32 %v1757_v50, %v603_v62  ;;  %v1728_v8 = vld [vmem:[%s2606_s5 + $0x20] sm:$0xff] }
  0xb0   : > { %1055 = vmatpush.bf16.msra.mxu2 %v1728_v8  ;;  %1735 = vmatpush.bf16.msra.mxu3 %v1728_v8 }
  0xb1   : > { %v1982_v10 = vadd.f32 %v1961_v56, %v517_v9 }
  0xb3   : > { %575 = vadd.xlane.f32.xlu2 %v1982_v10  ;;  %v627_v12 = vmul.f32 %v1982_v10, %v1982_v10 }
  0xb5   : > { %646 = vadd.xlane.f32.xlu1 %v627_v12  ;;  %v605_v12 = vadd.f32 %v1757_v50, %v604_v6 }
  0xb6   : > { %v519_v13 = vpop.f32.mrf.mxu1 }
  0xb7   : > { %v520_v14 = vadd.f32 %v519_v13, %v433_v11  ;;  %v435_v16 = vpop.f32.mrf.mxu0 }
  0xb9   : > { %v1988_v15 = vadd.f32 %v1961_v56, %v520_v14  ;;  %v1727_v14 = vld [vmem:[%s2606_s5 + $0x18] sm:$0xff] }
  0xba   : > { %1056 = vmatpush.bf16.msra.mxu2 %v1727_v14  ;;  %1736 = vmatpush.bf16.msra.mxu3 %v1727_v14 }
  0xbb   : > { %577 = vadd.xlane.f32.xlu2 %v1988_v15  ;;  %v628_v17 = vmul.f32 %v1988_v15, %v1988_v15 }
  0xbd   : > { %648 = vadd.xlane.f32.xlu1 %v628_v17  ;;  %v2060_v17 = vsel %vm606_vm3, %v1757_v50, %v605_v12 }
  0xbe   : > { %v521_v18 = vpop.f32.mrf.mxu1 }
  0xbf   : > { %v522_v19 = vadd.f32 %v521_v18, %v435_v16  ;;  %v438_v21 = vpop.f32.mrf.mxu0 }
  0xc1   : > { %v1994_v20 = vadd.f32 %v1961_v56, %v522_v19 }
  0xc3   : > { %579 = vadd.xlane.f32.xlu0 %v1994_v20  ;;  %v629_v22 = vmul.f32 %v1994_v20, %v1994_v20 }
  0xc5   : > { %650 = vadd.xlane.f32.xlu2 %v629_v22  ;;  %v1726_v22 = vld [vmem:[%s2606_s5 + $0x10] sm:$0xff] }
  0xc6   : > { %v524_v23 = vpop.f32.mrf.mxu1  ;;  %1057 = vmatpush.bf16.msra.mxu2 %v1726_v22  ;;  %1737 = vmatpush.bf16.msra.mxu3 %v1726_v22  ;;  %v2114_v22 = vld [vmem:[%s2605_s4 + $0x1] ss:$0 sm:$0xff] }
  0xc7   : > { %v525_v24 = vadd.f32 %v524_v23, %v438_v21  ;;  %v440_v26 = vpop.f32.mrf.mxu0 }
  0xc9   : > { %v2000_v25 = vadd.f32 %v1961_v56, %v525_v24 }
  0xcb   : > { %581 = vadd.xlane.f32.xlu0 %v2000_v25  ;;  %v630_v27 = vmul.f32 %v2000_v25, %v2000_v25 }
  0xcd   : > { %652 = vadd.xlane.f32.xlu2 %v630_v27 }
  0xce   : > { %v526_v28 = vpop.f32.mrf.mxu1 }
  0xcf   : > { %v527_v29 = vadd.f32 %v526_v28, %v440_v26  ;;  %v443_v31 = vpop.f32.mrf.mxu0 }
  0xd1   : > { %v2006_v30 = vadd.f32 %v1961_v56, %v527_v29 }
  0xd3   : > { %583 = vadd.xlane.f32.xlu1 %v2006_v30  ;;  %v631_v32 = vmul.f32 %v2006_v30, %v2006_v30 }
  0xd5   : > { %654 = vadd.xlane.f32.xlu0 %v631_v32 }
  0xd6   : > { %v529_v33 = vpop.f32.mrf.mxu1 }
  0xd7   : > { %v530_v34 = vadd.f32 %v529_v33, %v443_v31  ;;  %v445_v36 = vpop.f32.mrf.mxu0  ;;  %v1725_v31 = vld [vmem:[%s2606_s5 + $0x8] sm:$0xff] }
  0xd8   : > { %1058 = vmatpush.bf16.msra.mxu2 %v1725_v31  ;;  %1738 = vmatpush.bf16.msra.mxu3 %v1725_v31 }
  0xd9   : > { %v2012_v35 = vadd.f32 %v1961_v56, %v530_v34 }
  0xdb   : > { %585 = vadd.xlane.f32.xlu1 %v2012_v35  ;;  %v632_v37 = vmul.f32 %v2012_v35, %v2012_v35 }
  0xdd   : > { %656 = vadd.xlane.f32.xlu2 %v632_v37  ;;  %v1724_v37 = vld [vmem:[%s2606_s5] sm:$0xff] }
  0xde   : > { %v531_v38 = vpop.f32.mrf.mxu1  ;;  %1059 = vmatpush.bf16.msra.mxu2 %v1724_v37  ;;  %1739 = vmatpush.bf16.msra.mxu3 %v1724_v37 }
  0xdf   : > { %v532_v39 = vadd.f32 %v531_v38, %v445_v36  ;;  %v448_v41 = vpop.f32.mrf.mxu0 }
  0xe1   : > { %v2018_v40 = vadd.f32 %v1961_v56, %v532_v39 }
  0xe3   : > { %v633_v42 = vmul.f32 %v2018_v40, %v2018_v40 }
  0xe5   : > { %587 = vadd.xlane.f32.xlu2 %v2018_v40  ;;  %658 = vadd.xlane.f32.xlu0 %v633_v42 }
  0xe6   : > { %v534_v43 = vpop.f32.mrf.mxu1 }
  0xe7   : > { %v450_v44 = vpop.f32.mrf.mxu0  ;;  %v535_v57 = vadd.f32 %v534_v43, %v448_v41 }
  0xe9   : > { %v2036_v63 = vadd.f32 %v1961_v56, %v535_v57 }
  0xeb   : > { %v634_v34 = vmul.f32 %v2036_v63, %v2036_v63 }
  0xee   : > { %v536_v45 = vpop.f32.mrf.mxu1 }
  0xef   : > { %v453_v46 = vpop.f32.mrf.mxu0  ;;  %v537_v9 = vadd.f32 %v536_v45, %v450_v44 }
  0xf1   : > { %v2058_v16 = vadd.f32 %v1961_v56, %v537_v9 }
  0xf3   : > { %v635_v33 = vmul.f32 %v2058_v16, %v2058_v16 }
  0xf6   : > { %v539_v48 = vpop.f32.mrf.mxu1 }
  0xf7   : > { %v540_v49 = vadd.f32 %v539_v48, %v453_v46  ;;  %v455_v53 = vpop.f32.mrf.mxu0 }
  0xf9   : > { %v2024_v51 = vadd.f32 %v1961_v56, %v540_v49 }
  0xfb   : > { %593 = vadd.xlane.f32.xlu0 %v2024_v51  ;;  %v636_v54 = vmul.f32 %v2024_v51, %v2024_v51 }
  0xfd   : > { %664 = vadd.xlane.f32.xlu1 %v636_v54 }
  0xfe   : > { %v541_v58 = vpop.f32.mrf.mxu1 }
  0xff   : > { %v542_v61 = vadd.f32 %v541_v58, %v455_v53  ;;  %v458_v3 = vpop.f32.mrf.mxu0 }
 0x101   : > { %v2039_v1 = vadd.f32 %v1961_v56, %v542_v61 }
 0x103   : > { %589 = vadd.xlane.f32.xlu0 %v2036_v63  ;;  %v637_v4 = vmul.f32 %v2039_v1, %v2039_v1 }
 0x105   : > { %666 = vadd.xlane.f32.xlu2 %v637_v4  ;;  %595 = vadd.xlane.f32.xlu1 %v2039_v1 }
 0x106   : > { %v544_v7 = vpop.f32.mrf.mxu1 }
 0x107   : > { %v545_v11 = vadd.f32 %v544_v7, %v458_v3  ;;  %v460_v18 = vpop.f32.mrf.mxu0 }
 0x109   : > { %v2052_v13 = vadd.f32 %v1961_v56, %v545_v11 }
 0x10b   : > { %v638_v43 = vmul.f32 %v2052_v13, %v2052_v13 }
 0x10d   : > { %597 = vadd.xlane.f32.xlu2 %v2052_v13  ;;  %591 = vadd.xlane.f32.xlu1 %v2058_v16 }
 0x10e   : > { %v546_v19 = vpop.f32.mrf.mxu1  ;;  %v570_v21 = vpop.xlane.xlu0 %569 }
 0x10f   : > { %v547_v23 = vadd.f32 %v546_v19, %v460_v18  ;;  %v2068_v24 = vmul.f32 %v2060_v17, %v570_v21 }
 0x110   : > { %v641_v26 = vpop.xlane.xlu1 %640 }
 0x111   : > { %v2071_v27 = vadd.f32 %v1961_v56, %v547_v23  ;;  %v688_v28 = vmul.f32 %v2068_v24, %v2068_v24  ;;  %v672_v29 = vmul.f32 %v641_v26, %v2060_v17  ;;  %v720_v11 = vsub.f32 %v1964_v59, %v2068_v24 }
 0x113   : > { %v704_v32 = vsub.f32 %v672_v29, %v688_v28  ;;  %599 = vadd.xlane.f32.xlu0 %v2071_v27  ;;  %v639_v45 = vmul.f32 %v2071_v27, %v2071_v27 }
 0x115   : > { %v736_v56 = vadd.f32 1e-05, %v704_v32  ;;  %662 = vadd.xlane.f32.xlu2 %v635_v33  ;;  %660 = vadd.xlane.f32.xlu1 %v634_v34  ;;  %v2125_v34 = vld [vmem:[%s2605_s4 + $0x2] ss:$0 sm:$0xff] }
 0x116   : > { %v572_v36 = vpop.xlane.xlu0 %571 }
 0x117   : > { %1758 = vrsqrt.f32 %v736_v56  ;;  %v2088_v38 = vmul.f32 %v2060_v17, %v572_v36  ;;  %vm758_vm5 = vweird.f32 %v736_v56 }
 0x118   : > { %v643_v39 = vpop.xlane.xlu1 %642 }
 0x119   : > { %v689_v41 = vmul.f32 %v2088_v38, %v2088_v38  ;;  %v673_v42 = vmul.f32 %v643_v39, %v2060_v17  ;;  %v721_v31 = vsub.f32 %v1970_v0, %v2088_v38 }
 0x11b   : > { %v705_v44 = vsub.f32 %v673_v42, %v689_v41  ;;  %668 = vadd.xlane.f32.xlu0 %v638_v43 }
 0x11d   : > { %v1759_v46 = vpop.eup %1758  ;;  %v737_v47 = vadd.f32 1e-05, %v705_v44  ;;  %670 = vadd.xlane.f32.xlu1 %v639_v45 }
 0x11e   : > { %v753_v48 = vmul.f32 %v1759_v46, %v736_v56  ;;  %v574_v49 = vpop.xlane.xlu2 %573  ;;  %vm759_vm4 = vweird.f32 %v1759_v46 }
 0x11f   : > { %1760 = vrsqrt.f32 %v737_v47  ;;  %v2098_v50 = vmul.f32 %v2060_v17, %v574_v49  ;;  %vm760_vm6 = vmor %vm758_vm5, %vm759_vm4  ;;  %vm768_vm8 = vweird.f32 %v737_v47 }
 0x120   : > { %v754_v52 = vmul.f32 %v1759_v46, %v753_v48  ;;  %v645_v53 = vpop.xlane.xlu0 %644 }
 0x121   : > { %v690_v54 = vmul.f32 %v2098_v50, %v2098_v50  ;;  %v674_v55 = vmul.f32 %v645_v53, %v2060_v17 }
 0x122   : > { %v755_v57 = vmul.f32 0.5, %v754_v52 }
 0x123   : > { %v706_v58 = vsub.f32 %v674_v55, %v690_v54 }
 0x124   : > { %v756_v60 = vsub.f32 1.5, %v755_v57 }
 0x125   : > { %v1761_v61 = vpop.eup %1760  ;;  %v738_v62 = vadd.f32 1e-05, %v706_v58 }
 0x126   : > { %v757_v2 = vmul.f32 %v1759_v46, %v756_v60  ;;  %v763_v3 = vmul.f32 %v1761_v61, %v737_v47  ;;  %v576_v4 = vpop.xlane.xlu2 %575  ;;  %vm769_vm7 = vweird.f32 %v1761_v61 }
 0x127   : > { %1762 = vrsqrt.f32 %v738_v62  ;;  %v2104_v6 = vmul.f32 %v2060_v17, %v576_v4  ;;  %vm770_vm9 = vmor %vm768_vm8, %vm769_vm7  ;;  %vm778_vm11 = vweird.f32 %v738_v62 }
 0x128   : > { %v764_v7 = vmul.f32 %v1761_v61, %v763_v3  ;;  %v647_v8 = vpop.xlane.xlu1 %646  ;;  %v761_v9 = vsel %vm760_vm6, %v1759_v46, %v757_v2  ;;  %v722_v2 = vsub.f32 %v1976_v5, %v2098_v50 }
 0x129   : > { %v691_v12 = vmul.f32 %v2104_v6, %v2104_v6  ;;  %v675_v14 = vmul.f32 %v647_v8, %v2060_v17  ;;  %v912_v21 = vmul.f32 %v761_v9, %v720_v11  ;;  %v723_v5 = vsub.f32 %v1982_v10, %v2104_v6 }
 0x12a   : > { %v765_v18 = vmul.f32 0.5, %v764_v7 }
 0x12b   : > { %v707_v19 = vsub.f32 %v675_v14, %v691_v12  ;;  %v929_v33 = vmul.f32 %v2114_v22, %v912_v21 }
 0x12c   : > { %v766_v23 = vsub.f32 1.5, %v765_v18 }
 0x12d   : > { %v1763_v26 = vpop.eup %1762  ;;  %v739_v28 = vadd.f32 1e-05, %v707_v19  ;;  %v946_v44 = vadd.f32 %v2125_v34, %v929_v33 }
 0x12e   : > { %v767_v29 = vmul.f32 %v1761_v61, %v766_v23  ;;  %v773_v59 = vmul.f32 %v1763_v26, %v738_v62  ;;  %v578_v24 = vpop.xlane.xlu2 %577  ;;  %vm779_vm10 = vweird.f32 %v1763_v26 }
 0x12f   : > { %1764 = vrsqrt.f32 %v739_v28  ;;  %v2119_v32 = vmul.f32 %v2060_v17, %v578_v24  ;;  %vm780_vm12 = vmor %vm778_vm11, %vm779_vm10  ;;  %v962_v55 = vmax.f32 %v946_v44, 0.0  ;;  %vm788_vm14 = vweird.f32 %v739_v28 }
 0x130   : > { %v774_v56 = vmul.f32 %v1763_v26, %v773_v59  ;;  %v649_v36 = vpop.xlane.xlu1 %648  ;;  %v771_v37 = vsel %vm770_vm9, %v1761_v61, %v767_v29 }
 0x131   : > { %v692_v39 = vmul.f32 %v2119_v32, %v2119_v32  ;;  %v676_v0 = vmul.f32 %v649_v36, %v2060_v17  ;;  %v913_v38 = vmul.f32 %v771_v37, %v721_v31 }
 0x132   : > { %v775_v41 = vmul.f32 0.5, %v774_v56 }
 0x133   : > { %v708_v42 = vsub.f32 %v676_v0, %v692_v39  ;;  %v930_v43 = vmul.f32 %v2114_v22, %v913_v38 }
 0x134   : > { %v776_v45 = vsub.f32 1.5, %v775_v41 }
 0x135   : > { %v1765_v46 = vpop.eup %1764  ;;  %v740_v47 = vadd.f32 1e-05, %v708_v42  ;;  %v947_v48 = vadd.f32 %v2125_v34, %v930_v43 }
 0x136   : > { %v777_v49 = vmul.f32 %v1763_v26, %v776_v45  ;;  %v783_v52 = vmul.f32 %v1765_v46, %v739_v28  ;;  %v580_v53 = vpop.xlane.xlu0 %579  ;;  %vm789_vm13 = vweird.f32 %v1765_v46 }
 0x137   : > { %1766 = vrsqrt.f32 %v740_v47  ;;  %v2134_v54 = vmul.f32 %v2060_v17, %v580_v53  ;;  %v963_v57 = vmax.f32 %v947_v48, 0.0  ;;  %vm790_vm15 = vmor %vm788_vm14, %vm789_vm13  ;;  %vm798_vm1 = vweird.f32 %v740_v47 }
 0x138   : > { %v784_v58 = vmul.f32 %v1765_v46, %v783_v52  ;;  %v651_v60 = vpop.xlane.xlu2 %650  ;;  %v781_v61 = vsel %vm780_vm12, %v1763_v26, %v777_v49  ;;  %v724_v52 = vsub.f32 %v1988_v15, %v2119_v32 }
 0x139   : > { %v693_v3 = vmul.f32 %v2134_v54, %v2134_v54  ;;  %v677_v62 = vmul.f32 %v651_v60, %v2060_v17  ;;  %v978_v4 = vpack.c.bf16 %v963_v57, %v962_v55  ;;  %v914_v9 = vmul.f32 %v781_v61, %v722_v2 }
 0x13a   : > { %v785_v7 = vmul.f32 0.5, %v784_v58  ;;  %v725_v15 = vsub.f32 %v1994_v20, %v2134_v54 }
 0x13b   : > { %v709_v8 = vsub.f32 %v677_v62, %v693_v3  ;;  %1060 = vmatmul.bf16.vlgmr.msra.gmra.mxu2 %v978_v4  ;;  %v931_v23 = vmul.f32 %v2114_v22, %v914_v9 }
 0x13c   : > { %v786_v11 = vsub.f32 1.5, %v785_v7 }
 0x13d   : > { %v1767_v12 = vpop.eup %1766  ;;  %v741_v14 = vadd.f32 1e-05, %v709_v8  ;;  %v948_v6 = vadd.f32 %v2125_v34, %v931_v23 }
 0x13e   : > { %v787_v18 = vmul.f32 %v1765_v46, %v786_v11  ;;  %v793_v19 = vmul.f32 %v1767_v12, %v740_v47  ;;  %v582_v21 = vpop.xlane.xlu0 %581  ;;  %vm799_vm0 = vweird.f32 %v1767_v12 }
 0x13f   : > { %1768 = vrsqrt.f32 %v741_v14  ;;  %v2144_v50 = vmul.f32 %v2060_v17, %v582_v21  ;;  %vm800_vm2 = vmor %vm798_vm1, %vm799_vm0  ;;  %v964_v44 = vmax.f32 %v948_v6, 0.0  ;;  %vm808_vm4 = vweird.f32 %v741_v14 }
 0x140   : > { %v794_v26 = vmul.f32 %v1767_v12, %v793_v19  ;;  %v653_v29 = vpop.xlane.xlu2 %652  ;;  %v791_v59 = vsel %vm790_vm15, %v1765_v46, %v787_v18 }
 0x141   : > { %v694_v24 = vmul.f32 %v2144_v50, %v2144_v50  ;;  %v678_v28 = vmul.f32 %v653_v29, %v2060_v17  ;;  %v915_v31 = vmul.f32 %v791_v59, %v723_v5 }
 0x142   : > { %v795_v33 = vmul.f32 0.5, %v794_v26 }
 0x143   : > { %v710_v56 = vsub.f32 %v678_v28, %v694_v24  ;;  %v932_v10 = vmul.f32 %v2114_v22, %v915_v31 }
 0x144   : > { %v796_v36 = vsub.f32 1.5, %v795_v33 }
 0x145   : > { %v1769_v37 = vpop.eup %1768  ;;  %v742_v39 = vadd.f32 1e-05, %v710_v56  ;;  %v949_v0 = vadd.f32 %v2125_v34, %v932_v10 }
 0x146   : > { %v797_v38 = vmul.f32 %v1767_v12, %v796_v36  ;;  %v803_v41 = vmul.f32 %v1769_v37, %v741_v14  ;;  %v584_v42 = vpop.xlane.xlu1 %583  ;;  %vm809_vm3 = vweird.f32 %v1769_v37 }
 0x147   : > { %1770 = vrsqrt.f32 %v742_v39  ;;  %v2154_v43 = vmul.f32 %v2060_v17, %v584_v42  ;;  %v965_v45 = vmax.f32 %v949_v0, 0.0  ;;  %vm810_vm5 = vmor %vm808_vm4, %vm809_vm3  ;;  %vm818_vm7 = vweird.f32 %v742_v39 }
 0x148   : > { %v804_v46 = vmul.f32 %v1769_v37, %v803_v41  ;;  %v655_v48 = vpop.xlane.xlu0 %654  ;;  %v801_v49 = vsel %vm800_vm2, %v1767_v12, %v797_v38 }
 0x149   : > { %v695_v53 = vmul.f32 %v2154_v43, %v2154_v43  ;;  %v679_v47 = vmul.f32 %v655_v48, %v2060_v17  ;;  %v979_v55 = vpack.c.bf16 %v965_v45, %v964_v44  ;;  %v916_v60 = vmul.f32 %v801_v49, %v724_v52 }
 0x14a   : > { %v805_v57 = vmul.f32 0.5, %v804_v46 }
 0x14b   : > { %v711_v58 = vsub.f32 %v679_v47, %v695_v53  ;;  %1065 = vmatmul.bf16.gmra.mxu2 %v979_v55  ;;  %v933_v8 = vmul.f32 %v2114_v22, %v916_v60  ;;  %v727_v53 = vsub.f32 %v2006_v30, %v2154_v43 }
 0x14c   : > { %v806_v61 = vsub.f32 1.5, %v805_v57 }
 0x14d   : > { %v1771_v2 = vpop.eup %1770  ;;  %v743_v3 = vadd.f32 1e-05, %v711_v58  ;;  %v950_v54 = vadd.f32 %v2125_v34, %v933_v8 }
 0x14e   : > { %v807_v62 = vmul.f32 %v1769_v37, %v806_v61  ;;  %v813_v4 = vmul.f32 %v1771_v2, %v742_v39  ;;  %v586_v7 = vpop.xlane.xlu1 %585  ;;  %vm819_vm6 = vweird.f32 %v1771_v2 }
 0x14f   : > { %1772 = vrsqrt.f32 %v743_v3  ;;  %v2164_v32 = vmul.f32 %v2060_v17, %v586_v7  ;;  %vm820_vm8 = vmor %vm818_vm7, %vm819_vm6  ;;  %v966_v31 = vmax.f32 %v950_v54, 0.0  ;;  %vm828_vm10 = vweird.f32 %v743_v3 }
 0x150   : > { %v814_v9 = vmul.f32 %v1771_v2, %v813_v4  ;;  %v657_v11 = vpop.xlane.xlu2 %656  ;;  %v811_v12 = vsel %vm810_vm5, %v1769_v37, %v807_v62  ;;  %v726_v37 = vsub.f32 %v2000_v25, %v2144_v50 }
 0x151   : > { %v696_v18 = vmul.f32 %v2164_v32, %v2164_v32  ;;  %v680_v14 = vmul.f32 %v657_v11, %v2060_v17  ;;  %v917_v19 = vmul.f32 %v811_v12, %v725_v15  ;;  %v728_v11 = vsub.f32 %v2012_v35, %v2164_v32 }
 0x152   : > { %v815_v21 = vmul.f32 0.5, %v814_v9 }
 0x153   : > { %v712_v5 = vsub.f32 %v680_v14, %v696_v18  ;;  %v934_v20 = vmul.f32 %v2114_v22, %v917_v19 }
 0x154   : > { %v816_v23 = vsub.f32 1.5, %v815_v21 }
 0x155   : > { %v1773_v26 = vpop.eup %1772  ;;  %v744_v29 = vadd.f32 1e-05, %v712_v5  ;;  %v951_v59 = vadd.f32 %v2125_v34, %v934_v20 }
 0x156   : > { %v817_v24 = vmul.f32 %v1771_v2, %v816_v23  ;;  %v823_v28 = vmul.f32 %v1773_v26, %v743_v3  ;;  %vm829_vm9 = vweird.f32 %v1773_v26 }
 0x157   : > { %1774 = vrsqrt.f32 %v744_v29  ;;  %v967_v33 = vmax.f32 %v951_v59, 0.0  ;;  %vm830_vm11 = vmor %vm828_vm10, %vm829_vm9  ;;  %vm838_vm13 = vweird.f32 %v744_v29 }
 0x158   : > { %v824_v56 = vmul.f32 %v1773_v26, %v823_v28  ;;  %v588_v10 = vpop.xlane.xlu2 %587  ;;  %v659_v6 = vpop.xlane.xlu0 %658  ;;  %v821_v36 = vsel %vm820_vm8, %v1771_v2, %v817_v24 }
 0x159   : > { %v617_v0 = vmul.f32 %v2060_v17, %v588_v10  ;;  %v980_v38 = vpack.c.bf16 %v967_v33, %v966_v31  ;;  %v681_v44 = vmul.f32 %v659_v6, %v2060_v17  ;;  %v918_v39 = vmul.f32 %v821_v36, %v726_v37 }
 0x15a   : > { %v825_v41 = vmul.f32 0.5, %v824_v56 }
 0x15b   : > { %v697_v42 = vmul.f32 %v617_v0, %v617_v0  ;;  %1070 = vmatmul.bf16.gmra.mxu2 %v980_v38  ;;  %v935_v50 = vmul.f32 %v2114_v22, %v918_v39  ;;  %v729_v54 = vsub.f32 %v2018_v40, %v617_v0 }
 0x15c   : > { %v826_v45 = vsub.f32 1.5, %v825_v41 }
 0x15d   : > { %v1775_v46 = vpop.eup %1774  ;;  %v713_v48 = vsub.f32 %v681_v44, %v697_v42  ;;  %v952_v61 = vadd.f32 %v2125_v34, %v935_v50 }
 0x15e   : > { %v827_v49 = vmul.f32 %v1773_v26, %v826_v45  ;;  %v833_v52 = vmul.f32 %v1775_v46, %v744_v29  ;;  %vm839_vm12 = vweird.f32 %v1775_v46 }
 0x15f   : > { %v745_v25 = vadd.f32 1e-05, %v713_v48  ;;  %v968_v30 = vmax.f32 %v952_v61, 0.0  ;;  %vm840_vm14 = vmor %vm838_vm13, %vm839_vm12 }
 0x160   : > { %v834_v47 = vmul.f32 %v1775_v46, %v833_v52  ;;  %v831_v55 = vsel %vm830_vm11, %v1773_v26, %v827_v49 }
 0x161   : > { %1776 = vrsqrt.f32 %v745_v25  ;;  %v919_v57 = vmul.f32 %v831_v55, %v727_v53  ;;  %vm848_vm0 = vweird.f32 %v745_v25 }
 0x162   : > { %v835_v58 = vmul.f32 0.5, %v834_v47 }
 0x163   : > { %v936_v60 = vmul.f32 %v2114_v22, %v919_v57 }
 0x164   : > { %v836_v2 = vsub.f32 1.5, %v835_v58 }
 0x165   : > { %v953_v3 = vadd.f32 %v2125_v34, %v936_v60 }
 0x166   : > { %v837_v4 = vmul.f32 %v1775_v46, %v836_v2 }
 0x167   : > { %v1777_v62 = vpop.eup %1776  ;;  %v969_v43 = vmax.f32 %v953_v3, 0.0 }
 0x168   : > { %v843_v7 = vmul.f32 %v1777_v62, %v745_v25  ;;  %v841_v9 = vsel %vm840_vm14, %v1775_v46, %v837_v4  ;;  %vm849_vm15 = vweird.f32 %v1777_v62 }
 0x169   : > { %v981_v15 = vpack.c.bf16 %v969_v43, %v968_v30  ;;  %v920_v19 = vmul.f32 %v841_v9, %v728_v11  ;;  %vm850_vm1 = vmor %vm848_vm0, %vm849_vm15 }
 0x16a   : > { %v844_v8 = vmul.f32 %v1777_v62, %v843_v7 }
 0x16b   : > { %1075 = vmatmul.bf16.gmra.mxu2 %v981_v15  ;;  %v937_v32 = vmul.f32 %v2114_v22, %v920_v19 }
 0x16c   : > { %v845_v12 = vmul.f32 0.5, %v844_v8 }
 0x16d   : > { %v954_v31 = vadd.f32 %v2125_v34, %v937_v32 }
 0x16e   : > { %v846_v18 = vsub.f32 1.5, %v845_v12  ;;  %v594_v14 = vpop.xlane.xlu0 %593 }
 0x16f   : > { %v2186_v21 = vmul.f32 %v2060_v17, %v594_v14  ;;  %v970_v6 = vmax.f32 %v954_v31, 0.0 }
 0x170   : > { %v847_v5 = vmul.f32 %v1777_v62, %v846_v18  ;;  %v665_v20 = vpop.xlane.xlu1 %664 }
 0x171   : > { %v700_v23 = vmul.f32 %v2186_v21, %v2186_v21  ;;  %v684_v26 = vmul.f32 %v665_v20, %v2060_v17  ;;  %v732_v9 = vsub.f32 %v2024_v51, %v2186_v21 }
 0x172   : > { %v851_v35 = vsel %vm850_vm1, %v1777_v62, %v847_v5 }
 0x173   : > { %v716_v29 = vsub.f32 %v684_v26, %v700_v23  ;;  %v921_v59 = vmul.f32 %v851_v35, %v729_v54 }
 0x175   : > { %v748_v24 = vadd.f32 1e-05, %v716_v29  ;;  %v938_v28 = vmul.f32 %v2114_v22, %v921_v59 }
 0x176   : > { %v590_v39 = vpop.xlane.xlu0 %589 }
 0x177   : > { %1778 = vrsqrt.f32 %v748_v24  ;;  %v955_v33 = vadd.f32 %v2125_v34, %v938_v28  ;;  %v2199_v25 = vmul.f32 %v2060_v17, %v590_v39  ;;  %vm878_vm3 = vweird.f32 %v748_v24 }
 0x178   : > { %v667_v40 = vpop.xlane.xlu2 %666  ;;  %v596_v56 = vpop.xlane.xlu1 %595 }
 0x179   : > { %v621_v10 = vmul.f32 %v2060_v17, %v596_v56  ;;  %v971_v36 = vmax.f32 %v955_v33, 0.0  ;;  %v685_v37 = vmul.f32 %v667_v40, %v2060_v17  ;;  %v698_v2 = vmul.f32 %v2199_v25, %v2199_v25 }
 0x17b   : > { %v701_v0 = vmul.f32 %v621_v10, %v621_v10  ;;  %v982_v38 = vpack.c.bf16 %v971_v36, %v970_v6  ;;  %v733_v21 = vsub.f32 %v2039_v1, %v621_v10 }
 0x17d   : > { %v1779_v41 = vpop.eup %1778  ;;  %v717_v42 = vsub.f32 %v685_v37, %v701_v0  ;;  %1080 = vmatmul.bf16.gmra.mxu2 %v982_v38 }
 0x17e   : > { %v873_v44 = vmul.f32 %v1779_v41, %v748_v24  ;;  %vm879_vm2 = vweird.f32 %v1779_v41 }
 0x17f   : > { %v749_v45 = vadd.f32 1e-05, %v717_v42  ;;  %vm880_vm4 = vmor %vm878_vm3, %vm879_vm2 }
 0x180   : > { %v874_v46 = vmul.f32 %v1779_v41, %v873_v44  ;;  %v598_v48 = vpop.xlane.xlu2 %597  ;;  %v592_v49 = vpop.xlane.xlu1 %591 }
 0x181   : > { %1780 = vrsqrt.f32 %v749_v45  ;;  %v2202_v50 = vmul.f32 %v2060_v17, %v592_v49  ;;  %v2211_v43 = vmul.f32 %v2060_v17, %v598_v48  ;;  %vm888_vm6 = vweird.f32 %v749_v45 }
 0x182   : > { %v875_v52 = vmul.f32 0.5, %v874_v46 }
 0x183   : > { %v699_v3 = vmul.f32 %v2202_v50, %v2202_v50  ;;  %v702_v54 = vmul.f32 %v2211_v43, %v2211_v43 }
 0x184   : > { %v876_v53 = vsub.f32 1.5, %v875_v52 }
 0x186   : > { %v600_v47 = vpop.xlane.xlu0 %599  ;;  %v877_v57 = vmul.f32 %v1779_v41, %v876_v53 }
 0x187   : > { %v1781_v55 = vpop.eup %1780  ;;  %v2216_v12 = vmul.f32 %v2060_v17, %v600_v47 }
 0x188   : > { %v883_v58 = vmul.f32 %v1781_v55, %v749_v45  ;;  %v663_v60 = vpop.xlane.xlu2 %662  ;;  %v661_v61 = vpop.xlane.xlu1 %660  ;;  %v881_v8 = vsel %vm880_vm4, %v1779_v41, %v877_v57  ;;  %vm889_vm5 = vweird.f32 %v1781_v55 }
 0x189   : > { %v683_v62 = vmul.f32 %v663_v60, %v2060_v17  ;;  %v682_v4 = vmul.f32 %v661_v61, %v2060_v17  ;;  %v924_v20 = vmul.f32 %v881_v8, %v732_v9  ;;  %vm890_vm7 = vmor %vm888_vm6, %vm889_vm5  ;;  %v703_v35 = vmul.f32 %v2216_v12, %v2216_v12 }
 0x18a   : > { %v884_v30 = vmul.f32 %v1781_v55, %v883_v58  ;;  %v731_v60 = vsub.f32 %v2058_v16, %v2202_v50 }
 0x18b   : > { %v715_v7 = vsub.f32 %v683_v62, %v699_v3  ;;  %v714_v15 = vsub.f32 %v682_v4, %v698_v2  ;;  %v941_v24 = vmul.f32 %v2114_v22, %v924_v20  ;;  %v730_v2 = vsub.f32 %v2036_v63, %v2199_v25 }
 0x18c   : > { %v885_v11 = vmul.f32 0.5, %v884_v30  ;;  %v734_v63 = vsub.f32 %v2052_v13, %v2211_v43  ;;  %v735_v20 = vsub.f32 %v2071_v27, %v2216_v12  ;;  %v2248_v27 = vld [vmem:[%s2607_s6] ss:$0 sm:$0xff] }
 0x18d   : > { %v747_v18 = vadd.f32 1e-05, %v715_v7  ;;  %v746_v14 = vadd.f32 1e-05, %v714_v15  ;;  %v958_v10 = vadd.f32 %v2125_v34, %v941_v24 }
 0x18e   : > { %v886_v19 = vsub.f32 1.5, %v885_v11  ;;  %v669_v5 = vpop.xlane.xlu0 %668 }
 0x18f   : > { %1782 = vrsqrt.f32 %v747_v18  ;;  %v686_v23 = vmul.f32 %v669_v5, %v2060_v17  ;;  %v974_v44 = vmax.f32 %v958_v10, 0.0  ;;  %vm868_vm10 = vweird.f32 %v747_v18 }
 0x190   : > { %v887_v26 = vmul.f32 %v1781_v55, %v886_v19  ;;  %1784 = vrsqrt.f32 %v746_v14  ;;  %v671_v51 = vpop.xlane.xlu1 %670  ;;  %vm858_vm12 = vweird.f32 %v746_v14 }
 0x191   : > { %v718_v32 = vsub.f32 %v686_v23, %v702_v54  ;;  %v687_v29 = vmul.f32 %v671_v51, %v2060_v17 }
 0x192   : > { %v891_v59 = vsel %vm890_vm7, %v1781_v55, %v887_v26 }
 0x193   : > { %v925_v28 = vmul.f32 %v891_v59, %v733_v21  ;;  %v750_v31 = vadd.f32 1e-05, %v718_v32  ;;  %v719_v33 = vsub.f32 %v687_v29, %v703_v35 }
 0x195   : > { %v1783_v40 = vpop.eup %1782  ;;  %1786 = vrsqrt.f32 %v750_v31  ;;  %v751_v56 = vadd.f32 1e-05, %v719_v33  ;;  %v942_v6 = vmul.f32 %v2114_v22, %v925_v28  ;;  %vm898_vm15 = vweird.f32 %v750_v31 }
 0x196   : > { %v1785_v36 = vpop.eup %1784  ;;  %v863_v1 = vmul.f32 %v1783_v40, %v747_v18  ;;  %vm869_vm8 = vweird.f32 %v1783_v40 }
 0x197   : > { %v853_v37 = vmul.f32 %v1785_v36, %v746_v14  ;;  %1788 = vrsqrt.f32 %v751_v56  ;;  %v959_v38 = vadd.f32 %v2125_v34, %v942_v6  ;;  %vm859_vm9 = vweird.f32 %v1785_v36  ;;  %vm870_vm11 = vmor %vm868_vm10, %vm869_vm8 }
 0x198   : > { %v864_v0 = vmul.f32 %v1783_v40, %v863_v1  ;;  %vm860_vm13 = vmor %vm858_vm12, %vm859_vm9  ;;  %vm908_vm2 = vweird.f32 %v751_v56 }
 0x199   : > { %v854_v41 = vmul.f32 %v1785_v36, %v853_v37  ;;  %v975_v39 = vmax.f32 %v959_v38, 0.0 }
 0x19a   : > { %v865_v42 = vmul.f32 0.5, %v864_v0 }
 0x19b   : > { %v1787_v45 = vpop.eup %1786  ;;  %v855_v46 = vmul.f32 0.5, %v854_v41  ;;  %v984_v52 = vpack.c.bf16 %v975_v39, %v974_v44 }
 0x19c   : > { %v866_v48 = vsub.f32 1.5, %v865_v42  ;;  %v893_v49 = vmul.f32 %v1787_v45, %v750_v31  ;;  %vm899_vm14 = vweird.f32 %v1787_v45 }
 0x19d   : > { %v1789_v53 = vpop.eup %1788  ;;  %v856_v47 = vsub.f32 1.5, %v855_v46  ;;  %1090 = vmatmul.bf16.vlgmr.msra.gmra.mxu3 %v984_v52  ;;  %vm900_vm1 = vmor %vm898_vm15, %vm899_vm14 }
 0x19e   : > { %v867_v55 = vmul.f32 %v1783_v40, %v866_v48  ;;  %v894_v57 = vmul.f32 %v1787_v45, %v893_v49  ;;  %v903_v58 = vmul.f32 %v1789_v53, %v751_v56  ;;  %vm909_vm0 = vweird.f32 %v1789_v53 }
 0x19f   : > { %v857_v61 = vmul.f32 %v1785_v36, %v856_v47  ;;  %vm910_vm3 = vmor %vm908_vm2, %vm909_vm0 }
 0x1a0   : > { %v895_v3 = vmul.f32 0.5, %v894_v57  ;;  %v904_v62 = vmul.f32 %v1789_v53, %v903_v58  ;;  %v871_v4 = vsel %vm870_vm11, %v1783_v40, %v867_v55 }
 0x1a1   : > { %v861_v30 = vsel %vm860_vm13, %v1785_v36, %v857_v61  ;;  %v923_v7 = vmul.f32 %v871_v4, %v731_v60 }
 0x1a2   : > { %v896_v15 = vsub.f32 1.5, %v895_v3  ;;  %v905_v8 = vmul.f32 0.5, %v904_v62  ;;  %v922_v9 = vmul.f32 %v861_v30, %v730_v2 }
 0x1a3   : > { %v940_v11 = vmul.f32 %v2114_v22, %v923_v7 }
 0x1a4   : > { %v897_v16 = vmul.f32 %v1787_v45, %v896_v15  ;;  %v906_v50 = vsub.f32 1.5, %v905_v8  ;;  %v939_v18 = vmul.f32 %v2114_v22, %v922_v9 }
 0x1a5   : > { %v957_v25 = vadd.f32 %v2125_v34, %v940_v11 }
 0x1a6   : > { %v907_v14 = vmul.f32 %v1789_v53, %v906_v50  ;;  %v956_v19 = vadd.f32 %v2125_v34, %v939_v18  ;;  %v901_v5 = vsel %vm900_vm1, %v1787_v45, %v897_v16 }
 0x1a7   : > { %v973_v54 = vmax.f32 %v957_v25, 0.0  ;;  %v926_v23 = vmul.f32 %v901_v5, %v734_v63 }
 0x1a8   : > { %v972_v26 = vmax.f32 %v956_v19, 0.0  ;;  %v911_v51 = vsel %vm910_vm3, %v1789_v53, %v907_v14 }
 0x1a9   : > { %v927_v21 = vmul.f32 %v911_v51, %v735_v20  ;;  %v943_v35 = vmul.f32 %v2114_v22, %v926_v23 }
 0x1aa   : > { %v983_v13 = vpack.c.bf16 %v973_v54, %v972_v26 }
 0x1ab   : > { %v944_v43 = vmul.f32 %v2114_v22, %v927_v21  ;;  %v960_v32 = vadd.f32 %v2125_v34, %v943_v35 }
 0x1ac   : > { %1085 = vmatmul.bf16.gmra.mxu2 %v983_v13 }
 0x1ad   : > { %v961_v29 = vadd.f32 %v2125_v34, %v944_v43  ;;  %v976_v59 = vmax.f32 %v960_v32, 0.0 }
 0x1af   : > { %v977_v24 = vmax.f32 %v961_v29, 0.0 }
 0x1b1   : > { %v985_v28 = vpack.c.bf16 %v977_v24, %v976_v59 }
 0x1b3   : > { %1095 = vmatmul.bf16.gmra.mxu3 %v985_v28 }
 0x1be   : > { %v1061_v12 = vpop.f32.mrf.mxu2 }
 0x1bf   : > { %v2251_v31 = vadd.f32 %v2248_v27, %v1061_v12 }
 0x1c1   : > { %1103 = vadd.xlane.f32.xlu2 %v2251_v31  ;;  %v1151_v22 = vmul.f32 %v2251_v31, %v2251_v31 }
 0x1c3   : > { %1167 = vadd.xlane.f32.xlu0 %v1151_v22 }
 0x1c6   : > { %v1063_v34 = vpop.f32.mrf.mxu2 }
 0x1c7   : > { %v2257_v33 = vadd.f32 %v2248_v27, %v1063_v34 }
 0x1c9   : > { %v1152_v40 = vmul.f32 %v2257_v33, %v2257_v33 }
 0x1cb   : > { %1169 = vadd.xlane.f32.xlu1 %v1152_v40  ;;  %1105 = vadd.xlane.f32.xlu0 %v2257_v33 }
 0x1ce   : > { %v1066_v56 = vpop.f32.mrf.mxu2 }
 0x1cf   : > { %v2263_v6 = vadd.f32 %v2248_v27, %v1066_v56 }
 0x1d1   : > { %v1153_v36 = vmul.f32 %v2263_v6, %v2263_v6 }
 0x1d3   : > { %1107 = vadd.xlane.f32.xlu1 %v2263_v6  ;;  %1171 = vadd.xlane.f32.xlu2 %v1153_v36 }
 0x1d6   : > { %v1068_v1 = vpop.f32.mrf.mxu2 }
 0x1d7   : > { %v2269_v10 = vadd.f32 %v2248_v27, %v1068_v1 }
 0x1d9   : > { %v1154_v37 = vmul.f32 %v2269_v10, %v2269_v10 }
 0x1db   : > { %1173 = vadd.xlane.f32.xlu0 %v1154_v37  ;;  %1109 = vadd.xlane.f32.xlu2 %v2269_v10 }
 0x1de   : > { %v1071_v0 = vpop.f32.mrf.mxu2 }
 0x1df   : > { %v2275_v38 = vadd.f32 %v2248_v27, %v1071_v0 }
 0x1e1   : > { %v1155_v41 = vmul.f32 %v2275_v38, %v2275_v38 }
 0x1e3   : > { %1111 = vadd.xlane.f32.xlu0 %v2275_v38  ;;  %1175 = vadd.xlane.f32.xlu1 %v1155_v41 }
 0x1e6   : > { %v1073_v42 = vpop.f32.mrf.mxu2 }
 0x1e7   : > { %v2281_v44 = vadd.f32 %v2248_v27, %v1073_v42 }
 0x1e9   : > { %v1156_v39 = vmul.f32 %v2281_v44, %v2281_v44 }
 0x1eb   : > { %1177 = vadd.xlane.f32.xlu2 %v1156_v39  ;;  %1113 = vadd.xlane.f32.xlu1 %v2281_v44 }
 0x1ee   : > { %v1076_v45 = vpop.f32.mrf.mxu2 }
 0x1ef   : > { %v2287_v46 = vadd.f32 %v2248_v27, %v1076_v45  ;;  %v2362_v45 = vld [vmem:[%s2607_s6 + $0x1] ss:$0 sm:$0xff] }
 0x1f1   : > { %v1157_v48 = vmul.f32 %v2287_v46, %v2287_v46 }
 0x1f3   : > { %1115 = vadd.xlane.f32.xlu2 %v2287_v46  ;;  %1179 = vadd.xlane.f32.xlu0 %v1157_v48 }
 0x1f6   : > { %v1078_v49 = vpop.f32.mrf.mxu2 }
 0x1f7   : > { %v2293_v52 = vadd.f32 %v2248_v27, %v1078_v49 }
 0x1f9   : > { %v1158_v53 = vmul.f32 %v2293_v52, %v2293_v52 }
 0x1fb   : > { %1181 = vadd.xlane.f32.xlu1 %v1158_v53  ;;  %1117 = vadd.xlane.f32.xlu0 %v2293_v52 }
 0x200   : > { %v1081_v47 = vpop.f32.mrf.mxu2 }
 0x201   : > { %v2299_v55 = vadd.f32 %v2248_v27, %v1081_v47 }
 0x203   : > { %1119 = vadd.xlane.f32.xlu1 %v2299_v55  ;;  %v1159_v57 = vmul.f32 %v2299_v55, %v2299_v55 }
 0x205   : > { %1183 = vadd.xlane.f32.xlu2 %v1159_v57 }
 0x208   : > { %v1083_v58 = vpop.f32.mrf.mxu2 }
 0x209   : > { %v2305_v60 = vadd.f32 %v2248_v27, %v1083_v58 }
 0x20b   : > { %v1160_v61 = vmul.f32 %v2305_v60, %v2305_v60 }
 0x20d   : > { %1185 = vadd.xlane.f32.xlu0 %v1160_v61  ;;  %1121 = vadd.xlane.f32.xlu2 %v2305_v60 }
 0x220   : > { %v1091_v2 = vpop.f32.mrf.mxu3 }
 0x221   : > { %v2317_v7 = vadd.f32 %v2248_v27, %v1091_v2  ;;  %v2370_v2 = vld [vmem:[%s2607_s6 + $0x2] ss:$0 sm:$0xff] }
 0x223   : > { %v1163_v25 = vmul.f32 %v2317_v7, %v2317_v7 }
 0x228   : > { %v1093_v3 = vpop.f32.mrf.mxu3 }
 0x229   : > { %v2333_v26 = vadd.f32 %v2248_v27, %v1093_v3 }
 0x22f   : > { %v1086_v62 = vpop.f32.mrf.mxu2 }
 0x230   : > { %v2311_v4 = vadd.f32 %v2248_v27, %v1086_v62 }
 0x232   : > { %1123 = vadd.xlane.f32.xlu0 %v2311_v4  ;;  %v1161_v30 = vmul.f32 %v2311_v4, %v2311_v4 }
 0x234   : > { %1187 = vadd.xlane.f32.xlu1 %v1161_v30  ;;  %v1104_v15 = vpop.xlane.xlu2 %1103 }
 0x235   : > { %v1135_v8 = vmul.f32 %v1104_v15, %v2060_v17 }
 0x236   : > { %v1168_v9 = vpop.xlane.xlu0 %1167  ;;  %v1096_v18 = vpop.f32.mrf.mxu3 }
 0x237   : > { %v1215_v11 = vmul.f32 %v1135_v8, %v1135_v8  ;;  %v1199_v16 = vmul.f32 %v1168_v9, %v2060_v17  ;;  %v1088_v50 = vpop.f32.mrf.mxu2  ;;  %v2339_v13 = vadd.f32 %v2248_v27, %v1096_v18  ;;  %v1247_v39 = vsub.f32 %v2251_v31, %v1135_v8 }
 0x238   : > { %v2322_v63 = vadd.f32 %v2248_v27, %v1088_v50  ;;  %v2382_v50 = vld [vmem:[%s2607_s6 + $0x3] ss:$0 sm:$0xff] }
 0x239   : > { %v1231_v14 = vsub.f32 %v1199_v16, %v1215_v11  ;;  %v1165_v8 = vmul.f32 %v2339_v13, %v2339_v13 }
 0x23a   : > { %1191 = vadd.xlane.f32.xlu0 %v1163_v25  ;;  %v1162_v19 = vmul.f32 %v2322_v63, %v2322_v63 }
 0x23b   : > { %v1263_v5 = vadd.f32 1e-05, %v1231_v14 }
 0x23c   : > { %1189 = vadd.xlane.f32.xlu2 %v1162_v19  ;;  %1125 = vadd.xlane.f32.xlu1 %v2322_v63 }
 0x23d   : > { %1790 = vrsqrt.f32 %v1263_v5  ;;  %vm1285_vm5 = vweird.f32 %v1263_v5 }
 0x23e   : > { %v1106_v20 = vpop.xlane.xlu0 %1105  ;;  %v1170_v23 = vpop.xlane.xlu1 %1169 }
 0x23f   : > { %v2330_v54 = vmul.f32 %v1106_v20, %v2060_v17  ;;  %v1098_v21 = vpop.f32.mrf.mxu3  ;;  %v1200_v35 = vmul.f32 %v1170_v23, %v2060_v17 }
 0x240   : > { %v2343_v59 = vadd.f32 %v2248_v27, %v1098_v21  ;;  %v1164_v27 = vmul.f32 %v2333_v26, %v2333_v26 }
 0x241   : > { %v1216_v51 = vmul.f32 %v2330_v54, %v2330_v54  ;;  %v1248_v23 = vsub.f32 %v2257_v33, %v2330_v54 }
 0x242   : > { %1129 = vadd.xlane.f32.xlu0 %v2333_v26  ;;  %v1166_v56 = vmul.f32 %v2343_v59, %v2343_v59 }
 0x243   : > { %v1791_v43 = vpop.eup %1790  ;;  %v1232_v32 = vsub.f32 %v1200_v35, %v1216_v51 }
 0x244   : > { %v1280_v29 = vmul.f32 %v1791_v43, %v1263_v5  ;;  %1127 = vadd.xlane.f32.xlu2 %v2317_v7  ;;  %1131 = vadd.xlane.f32.xlu1 %v2339_v13  ;;  %vm1286_vm4 = vweird.f32 %v1791_v43 }
 0x245   : > { %v1264_v24 = vadd.f32 1e-05, %v1232_v32  ;;  %vm1287_vm6 = vmor %vm1285_vm5, %vm1286_vm4 }
 0x246   : > { %v1281_v28 = vmul.f32 %v1791_v43, %v1280_v29  ;;  %v1172_v12 = vpop.xlane.xlu2 %1171  ;;  %v1108_v22 = vpop.xlane.xlu1 %1107 }
 0x247   : > { %1792 = vrsqrt.f32 %v1264_v24  ;;  %v2348_v40 = vmul.f32 %v1108_v22, %v2060_v17  ;;  %v1201_v1 = vmul.f32 %v1172_v12, %v2060_v17  ;;  %vm1295_vm8 = vweird.f32 %v1264_v24 }
 0x248   : > { %v1282_v34 = vmul.f32 0.5, %v1281_v28 }
 0x249   : > { %v1217_v37 = vmul.f32 %v2348_v40, %v2348_v40 }
 0x24a   : > { %v1283_v36 = vsub.f32 1.5, %v1282_v34  ;;  %1197 = vadd.xlane.f32.xlu0 %v1166_v56 }
 0x24b   : > { %v1233_v41 = vsub.f32 %v1201_v1, %v1217_v37 }
 0x24c   : > { %v1284_v0 = vmul.f32 %v1791_v43, %v1283_v36  ;;  %1133 = vadd.xlane.f32.xlu2 %v2343_v59  ;;  %1193 = vadd.xlane.f32.xlu1 %v1164_v27 }
 0x24d   : > { %v1793_v42 = vpop.eup %1792  ;;  %v1265_v49 = vadd.f32 1e-05, %v1233_v41 }
 0x24e   : > { %v1290_v48 = vmul.f32 %v1793_v42, %v1264_v24  ;;  %v1174_v53 = vpop.xlane.xlu0 %1173  ;;  %v1110_v47 = vpop.xlane.xlu2 %1109  ;;  %v1288_v57 = vsel %vm1287_vm6, %v1791_v43, %v1284_v0  ;;  %vm1296_vm7 = vweird.f32 %v1793_v42 }
 0x24f   : > { %v2365_v58 = vmul.f32 %v1110_v47, %v2060_v17  ;;  %v1439_v61 = vmul.f32 %v1288_v57, %v1247_v39  ;;  %1794 = vrsqrt.f32 %v1265_v49  ;;  %v1202_v3 = vmul.f32 %v1174_v53, %v2060_v17  ;;  %vm1297_vm9 = vmor %vm1295_vm8, %vm1296_vm7 }
 0x250   : > { %v1291_v31 = vmul.f32 %v1793_v42, %v1290_v48  ;;  %vm1305_vm11 = vweird.f32 %v1265_v49  ;;  %v1249_v39 = vsub.f32 %v2263_v6, %v2348_v40 }
 0x251   : > { %v1218_v62 = vmul.f32 %v2365_v58, %v2365_v58  ;;  %v1456_v30 = vmul.f32 %v2362_v45, %v1439_v61 }
 0x252   : > { %v1292_v15 = vmul.f32 0.5, %v1291_v31 }
 0x253   : > { %v1234_v9 = vsub.f32 %v1202_v3, %v1218_v62  ;;  %v1473_v11 = vadd.f32 %v2370_v2, %v1456_v30 }
 0x254   : > { %v1293_v16 = vsub.f32 1.5, %v1292_v15  ;;  %1195 = vadd.xlane.f32.xlu2 %v1165_v8 }
 0x255   : > { %v1266_v18 = vadd.f32 1e-05, %v1234_v9  ;;  %v1489_v25 = vmax.f32 %v1473_v11, 0.0  ;;  %v1795_v14 = vpop.eup %1794 }
 0x256   : > { %v1294_v19 = vmul.f32 %v1793_v42, %v1293_v16  ;;  %v1112_v5 = vpop.xlane.xlu0 %1111  ;;  %v1176_v20 = vpop.xlane.xlu1 %1175  ;;  %v1300_v51 = vmul.f32 %v1795_v14, %v1265_v49  ;;  %vm1306_vm10 = vweird.f32 %v1795_v14  ;;  %v1250_v16 = vsub.f32 %v2269_v10, %v2365_v58 }
 0x257   : > { %1796 = vrsqrt.f32 %v1266_v18  ;;  %v2387_v21 = vmul.f32 %v1112_v5, %v2060_v17  ;;  %v1507_v35 = vmul.f32 %v2382_v50, %v1489_v25  ;;  %v1203_v24 = vmul.f32 %v1176_v20, %v2060_v17  ;;  %vm1307_vm12 = vmor %vm1305_vm11, %vm1306_vm10 }
 0x258   : > { %v1298_v43 = vsel %vm1297_vm9, %v1793_v42, %v1294_v19  ;;  %v1301_v32 = vmul.f32 %v1795_v14, %v1300_v51  ;;  %vm1315_vm14 = vweird.f32 %v1266_v18 }
 0x259   : > { %v1440_v29 = vmul.f32 %v1298_v43, %v1248_v23  ;;  %v1219_v28 = vmul.f32 %v2387_v21, %v2387_v21  ;;  %1523 = vadd.xlane.f32.xlu1 %v1507_v35 }
 0x25a   : > { %v1302_v12 = vmul.f32 0.5, %v1301_v32 }
 0x25b   : > { %v1457_v33 = vmul.f32 %v2362_v45, %v1440_v29  ;;  %v1235_v54 = vsub.f32 %v1203_v24, %v1219_v28 }
 0x25c   : > { %v1303_v34 = vsub.f32 1.5, %v1302_v12 }
 0x25d   : > { %v1797_v22 = vpop.eup %1796  ;;  %v1474_v56 = vadd.f32 %v2370_v2, %v1457_v33  ;;  %v1267_v36 = vadd.f32 1e-05, %v1235_v54 }
 0x25e   : > { %v1310_v27 = vmul.f32 %v1797_v22, %v1266_v18  ;;  %v1178_v1 = vpop.xlane.xlu2 %1177  ;;  %v1114_v37 = vpop.xlane.xlu1 %1113  ;;  %v1304_v0 = vmul.f32 %v1795_v14, %v1303_v34  ;;  %vm1316_vm13 = vweird.f32 %v1797_v22 }
 0x25f   : > { %v2396_v41 = vmul.f32 %v1114_v37, %v2060_v17  ;;  %v1490_v42 = vmax.f32 %v1474_v56, 0.0  ;;  %1798 = vrsqrt.f32 %v1267_v36  ;;  %v1204_v47 = vmul.f32 %v1178_v1, %v2060_v17  ;;  %vm1317_vm15 = vmor %vm1315_vm14, %vm1316_vm13 }
 0x260   : > { %v1311_v48 = vmul.f32 %v1797_v22, %v1310_v27  ;;  %v1308_v53 = vsel %vm1307_vm12, %v1795_v14, %v1304_v0  ;;  %vm1325_vm1 = vweird.f32 %v1267_v36  ;;  %v1251_v27 = vsub.f32 %v2275_v38, %v2387_v21 }
 0x261   : > { %v1220_v57 = vmul.f32 %v2396_v41, %v2396_v41  ;;  %v1508_v61 = vmul.f32 %v2382_v50, %v1490_v42  ;;  %v1441_v31 = vmul.f32 %v1308_v53, %v1249_v39 }
 0x262   : > { %v1312_v49 = vmul.f32 0.5, %v1311_v48 }
 0x263   : > { %v1236_v3 = vsub.f32 %v1204_v47, %v1220_v57  ;;  %1525 = vadd.xlane.f32.xlu2 %v1508_v61  ;;  %v1458_v30 = vmul.f32 %v2362_v45, %v1441_v31 }
 0x264   : > { %v1313_v62 = vsub.f32 1.5, %v1312_v49  ;;  %v1252_v49 = vsub.f32 %v2281_v44, %v2396_v41 }
 0x265   : > { %v1268_v6 = vadd.f32 1e-05, %v1236_v3  ;;  %v1799_v40 = vpop.eup %1798  ;;  %v1475_v11 = vadd.f32 %v2370_v2, %v1458_v30 }
 0x266   : > { %v1314_v15 = vmul.f32 %v1797_v22, %v1313_v62  ;;  %v1116_v8 = vpop.xlane.xlu2 %1115  ;;  %v1180_v9 = vpop.xlane.xlu0 %1179  ;;  %v1320_v25 = vmul.f32 %v1799_v40, %v1267_v36  ;;  %vm1326_vm0 = vweird.f32 %v1799_v40 }
 0x267   : > { %1800 = vrsqrt.f32 %v1268_v6  ;;  %v2409_v19 = vmul.f32 %v1116_v8, %v2060_v17  ;;  %v1491_v5 = vmax.f32 %v1475_v11, 0.0  ;;  %v1205_v51 = vmul.f32 %v1180_v9, %v2060_v17  ;;  %vm1327_vm2 = vmor %vm1325_vm1, %vm1326_vm0 }
 0x268   : > { %v1318_v14 = vsel %vm1317_vm15, %v1797_v22, %v1314_v15  ;;  %v1321_v23 = vmul.f32 %v1799_v40, %v1320_v25  ;;  %vm1335_vm4 = vweird.f32 %v1268_v6 }
 0x269   : > { %v1442_v20 = vmul.f32 %v1318_v14, %v1250_v16  ;;  %v1221_v18 = vmul.f32 %v2409_v19, %v2409_v19  ;;  %v1509_v35 = vmul.f32 %v2382_v50, %v1491_v5 }
 0x26a   : > { %v1322_v43 = vmul.f32 0.5, %v1321_v23 }
 0x26b   : > { %v1459_v10 = vmul.f32 %v2362_v45, %v1442_v20  ;;  %v1237_v58 = vsub.f32 %v1205_v51, %v1221_v18  ;;  %1527 = vadd.xlane.f32.xlu0 %v1509_v35 }
 0x26c   : > { %v1323_v29 = vsub.f32 1.5, %v1322_v43 }
 0x26d   : > { %v1801_v32 = vpop.eup %1800  ;;  %v1476_v28 = vadd.f32 %v2370_v2, %v1459_v10  ;;  %v1269_v12 = vadd.f32 1e-05, %v1237_v58  ;;  %v1253_v10 = vsub.f32 %v2287_v46, %v2409_v19 }
 0x26e   : > { %v1330_v24 = vmul.f32 %v1801_v32, %v1268_v6  ;;  %v1118_v33 = vpop.xlane.xlu0 %1117  ;;  %v1182_v54 = vpop.xlane.xlu1 %1181  ;;  %v1324_v22 = vmul.f32 %v1799_v40, %v1323_v29  ;;  %vm1336_vm3 = vweird.f32 %v1801_v32 }
 0x26f   : > { %v2418_v34 = vmul.f32 %v1118_v33, %v2060_v17  ;;  %v1492_v56 = vmax.f32 %v1476_v28, 0.0  ;;  %1802 = vrsqrt.f32 %v1269_v12  ;;  %v1206_v0 = vmul.f32 %v1182_v54, %v2060_v17  ;;  %vm1337_vm5 = vmor %vm1335_vm4, %vm1336_vm3 }
 0x270   : > { %v1331_v1 = vmul.f32 %v1801_v32, %v1330_v24  ;;  %v1328_v39 = vsel %vm1327_vm2, %v1799_v40, %v1324_v22  ;;  %vm1345_vm7 = vweird.f32 %v1269_v12 }
 0x271   : > { %v1222_v37 = vmul.f32 %v2418_v34, %v2418_v34  ;;  %v1510_v42 = vmul.f32 %v2382_v50, %v1492_v56  ;;  %v1443_v36 = vmul.f32 %v1328_v39, %v1251_v27 }
 0x272   : > { %v1332_v48 = vmul.f32 0.5, %v1331_v1 }
 0x273   : > { %v1238_v53 = vsub.f32 %v1206_v0, %v1222_v37  ;;  %1529 = vadd.xlane.f32.xlu1 %v1510_v42  ;;  %v1460_v57 = vmul.f32 %v2362_v45, %v1443_v36  ;;  %v1254_v42 = vsub.f32 %v2293_v52, %v2418_v34 }
 0x274   : > { %v1333_v47 = vsub.f32 1.5, %v1332_v48 }
 0x275   : > { %v1270_v38 = vadd.f32 1e-05, %v1238_v53  ;;  %v1803_v21 = vpop.eup %1802  ;;  %v1477_v31 = vadd.f32 %v2370_v2, %v1460_v57 }
 0x276   : > { %v1334_v61 = vmul.f32 %v1801_v32, %v1333_v47  ;;  %v1340_v3 = vmul.f32 %v1803_v21, %v1269_v12  ;;  %v1120_v62 = vpop.xlane.xlu1 %1119  ;;  %vm1346_vm6 = vweird.f32 %v1803_v21 }
 0x277   : > { %1804 = vrsqrt.f32 %v1270_v38  ;;  %v2431_v40 = vmul.f32 %v1120_v62, %v2060_v17  ;;  %v1493_v15 = vmax.f32 %v1477_v31, 0.0  ;;  %vm1347_vm8 = vmor %vm1345_vm7, %vm1346_vm6  ;;  %vm1355_vm10 = vweird.f32 %v1270_v38 }
 0x278   : > { %v1338_v30 = vsel %vm1337_vm5, %v1801_v32, %v1334_v61  ;;  %v1341_v9 = vmul.f32 %v1803_v21, %v1340_v3  ;;  %v1184_v11 = vpop.xlane.xlu2 %1183 }
 0x279   : > { %v1444_v8 = vmul.f32 %v1338_v30, %v1252_v49  ;;  %v1223_v6 = vmul.f32 %v2431_v40, %v2431_v40  ;;  %v1207_v16 = vmul.f32 %v1184_v11, %v2060_v17  ;;  %v1511_v25 = vmul.f32 %v2382_v50, %v1493_v15 }
 0x27a   : > { %v1342_v44 = vmul.f32 0.5, %v1341_v9  ;;  %v1255_v62 = vsub.f32 %v2299_v55, %v2431_v40 }
 0x27b   : > { %v1461_v41 = vmul.f32 %v2362_v45, %v1444_v8  ;;  %v1239_v14 = vsub.f32 %v1207_v16, %v1223_v6  ;;  %1531 = vadd.xlane.f32.xlu2 %v1511_v25 }
 0x27c   : > { %v1343_v20 = vsub.f32 1.5, %v1342_v44 }
 0x27d   : > { %v1805_v5 = vpop.eup %1804  ;;  %v1478_v23 = vadd.f32 %v2370_v2, %v1461_v41  ;;  %v1271_v51 = vadd.f32 1e-05, %v1239_v14 }
 0x27e   : > { %v1350_v18 = vmul.f32 %v1805_v5, %v1270_v38  ;;  %v1344_v35 = vmul.f32 %v1803_v21, %v1343_v20  ;;  %vm1356_vm9 = vweird.f32 %v1805_v5 }
 0x27f   : > { %v1494_v43 = vmax.f32 %v1478_v23, 0.0  ;;  %1806 = vrsqrt.f32 %v1271_v51  ;;  %vm1357_vm11 = vmor %vm1355_vm10, %vm1356_vm9  ;;  %vm1365_vm13 = vweird.f32 %v1271_v51 }
 0x280   : > { %v1351_v58 = vmul.f32 %v1805_v5, %v1350_v18  ;;  %v1186_v32 = vpop.xlane.xlu0 %1185  ;;  %v1122_v29 = vpop.xlane.xlu2 %1121  ;;  %v1348_v24 = vsel %vm1347_vm8, %v1803_v21, %v1344_v35  ;;  %vm1573_vm8 = vcmask 7168  }
 0x281   : > { %v1512_v28 = vmul.f32 %v2382_v50, %v1494_v43  ;;  %v1144_v54 = vmul.f32 %v1122_v29, %v2060_v17  ;;  %v1445_v22 = vmul.f32 %v1348_v24, %v1253_v10  ;;  %v1208_v12 = vmul.f32 %v1186_v32, %v2060_v17 }
 0x282   : > { %v1352_v33 = vmul.f32 0.5, %v1351_v58 }
 0x283   : > { %1533 = vadd.xlane.f32.xlu0 %v1512_v28  ;;  %v1224_v27 = vmul.f32 %v1144_v54, %v1144_v54  ;;  %v1462_v46 = vmul.f32 %v2362_v45, %v1445_v22  ;;  %v1256_v55 = vsub.f32 %v2305_v60, %v1144_v54 }
 0x284   : > { %v1353_v56 = vsub.f32 1.5, %v1352_v33 }
 0x285   : > { %v1807_v19 = vpop.eup %1806  ;;  %v1240_v37 = vsub.f32 %v1208_v12, %v1224_v27  ;;  %v1479_v0 = vadd.f32 %v2370_v2, %v1462_v46 }
 0x286   : > { %v1354_v1 = vmul.f32 %v1805_v5, %v1353_v56  ;;  %v1360_v39 = vmul.f32 %v1807_v19, %v1271_v51  ;;  %vm1366_vm12 = vweird.f32 %v1807_v19 }
 0x287   : > { %v1272_v48 = vadd.f32 1e-05, %v1240_v37  ;;  %v1495_v36 = vmax.f32 %v1479_v0, 0.0  ;;  %vm1367_vm14 = vmor %vm1365_vm13, %vm1366_vm12 }
 0x288   : > { %v1358_v53 = vsel %vm1357_vm11, %v1805_v5, %v1354_v1  ;;  %v1361_v47 = vmul.f32 %v1807_v19, %v1360_v39 }
 0x289   : > { %v1446_v57 = vmul.f32 %v1358_v53, %v1254_v42  ;;  %1808 = vrsqrt.f32 %v1272_v48  ;;  %v1513_v21 = vmul.f32 %v2382_v50, %v1495_v36  ;;  %vm1375_vm0 = vweird.f32 %v1272_v48 }
 0x28a   : > { %v1362_v61 = vmul.f32 0.5, %v1361_v47 }
 0x28b   : > { %v1463_v31 = vmul.f32 %v2362_v45, %v1446_v57  ;;  %1535 = vadd.xlane.f32.xlu1 %v1513_v21 }
 0x28c   : > { %v1363_v38 = vsub.f32 1.5, %v1362_v61 }
 0x28d   : > { %v1480_v49 = vadd.f32 %v2370_v2, %v1463_v31 }
 0x28e   : > { %v1364_v3 = vmul.f32 %v1807_v19, %v1363_v38 }
 0x28f   : > { %v1496_v52 = vmax.f32 %v1480_v49, 0.0  ;;  %v1809_v34 = vpop.eup %1808 }
 0x290   : > { %v1370_v30 = vmul.f32 %v1809_v34, %v1272_v48  ;;  %v1368_v8 = vsel %vm1367_vm14, %v1807_v19, %v1364_v3  ;;  %vm1376_vm15 = vweird.f32 %v1809_v34 }
 0x291   : > { %v1514_v15 = vmul.f32 %v2382_v50, %v1496_v52  ;;  %v1447_v9 = vmul.f32 %v1368_v8, %v1255_v62  ;;  %vm1377_vm1 = vmor %vm1375_vm0, %vm1376_vm15 }
 0x292   : > { %v1371_v11 = vmul.f32 %v1809_v34, %v1370_v30 }
 0x293   : > { %1537 = vadd.xlane.f32.xlu2 %v1514_v15  ;;  %v1464_v6 = vmul.f32 %v2362_v45, %v1447_v9 }
 0x294   : > { %v1372_v16 = vmul.f32 0.5, %v1371_v11 }
 0x295   : > { %v1481_v25 = vadd.f32 %v2370_v2, %v1464_v6 }
 0x296   : > { %v1373_v44 = vsub.f32 1.5, %v1372_v16 }
 0x297   : > { %v1497_v41 = vmax.f32 %v1481_v25, 0.0 }
 0x298   : > { %v1374_v14 = vmul.f32 %v1809_v34, %v1373_v44 }
 0x299   : > { %v1515_v40 = vmul.f32 %v2382_v50, %v1497_v41 }
 0x29a   : > { %v1378_v5 = vsel %vm1377_vm1, %v1809_v34, %v1374_v14 }
 0x29b   : > { %v1448_v20 = vmul.f32 %v1378_v5, %v1256_v55  ;;  %1539 = vadd.xlane.f32.xlu0 %v1515_v40 }
 0x29d   : > { %v1465_v23 = vmul.f32 %v2362_v45, %v1448_v20 }
 0x29f   : > { %v1482_v18 = vadd.f32 %v2370_v2, %v1465_v23 }
 0x2a1   : > { %v1498_v51 = vmax.f32 %v1482_v18, 0.0 }
 0x2a3   : > { %v1516_v35 = vmul.f32 %v2382_v50, %v1498_v51 }
 0x2a5   : > { %v1124_v43 = vpop.xlane.xlu0 %1123  ;;  %1541 = vadd.xlane.f32.xlu1 %v1516_v35 }
 0x2a6   : > { %v1145_v10 = vmul.f32 %v1124_v43, %v2060_v17 }
 0x2a7   : > { %v1188_v58 = vpop.xlane.xlu1 %1187 }
 0x2a8   : > { %v1225_v32 = vmul.f32 %v1145_v10, %v1145_v10  ;;  %v1209_v60 = vmul.f32 %v1188_v58, %v2060_v17  ;;  %v1257_v49 = vsub.f32 %v2311_v4, %v1145_v10 }
 0x2aa   : > { %v1241_v29 = vsub.f32 %v1209_v60, %v1225_v32 }
 0x2ac   : > { %v1273_v28 = vadd.f32 1e-05, %v1241_v29 }
 0x2ad   : > { %v1192_v24 = vpop.xlane.xlu0 %1191 }
 0x2ae   : > { %1810 = vrsqrt.f32 %v1273_v28  ;;  %v1211_v47 = vmul.f32 %v1192_v24, %v2060_v17  ;;  %vm1385_vm3 = vweird.f32 %v1273_v28 }
 0x2af   : > { %v1190_v33 = vpop.xlane.xlu2 %1189  ;;  %v1126_v54 = vpop.xlane.xlu1 %1125 }
 0x2b0   : > { %v2464_v22 = vmul.f32 %v1126_v54, %v2060_v17  ;;  %v1210_v56 = vmul.f32 %v1190_v33, %v2060_v17 }
 0x2b2   : > { %v1226_v12 = vmul.f32 %v2464_v22, %v2464_v22  ;;  %v1258_v58 = vsub.f32 %v2322_v63, %v2464_v22 }
 0x2b4   : > { %v1811_v27 = vpop.eup %1810  ;;  %v1242_v46 = vsub.f32 %v1210_v56, %v1226_v12  ;;  %v2509_v12 = vstv %s1555_s10 }
 0x2b5   : > { %v1380_v19 = vmul.f32 %v1811_v27, %v1273_v28  ;;  %v1130_v1 = vpop.xlane.xlu0 %1129  ;;  %vm1386_vm2 = vweird.f32 %v1811_v27 }
 0x2b6   : > { %v1274_v37 = vadd.f32 1e-05, %v1242_v46  ;;  %v2476_v21 = vmul.f32 %v1130_v1, %v2060_v17  ;;  %vm1387_vm4 = vmor %vm1385_vm3, %vm1386_vm2 }
 0x2b7   : > { %v1381_v0 = vmul.f32 %v1811_v27, %v1380_v19  ;;  %v1128_v42 = vpop.xlane.xlu2 %1127  ;;  %v1132_v39 = vpop.xlane.xlu1 %1131 }
 0x2b8   : > { %1812 = vrsqrt.f32 %v1274_v37  ;;  %v2470_v36 = vmul.f32 %v1128_v42, %v2060_v17  ;;  %v1228_v8 = vmul.f32 %v2476_v21, %v2476_v21  ;;  %v2496_v23 = vmul.f32 %v1132_v39, %v2060_v17 }
 0x2b9   : > { %v1382_v48 = vmul.f32 0.5, %v1381_v0  ;;  %vm1395_vm6 = vweird.f32 %v1274_v37 }
 0x2ba   : > { %v1227_v57 = vmul.f32 %v2470_v36, %v2470_v36  ;;  %v1229_v29 = vmul.f32 %v2496_v23, %v2496_v23 }
 0x2bb   : > { %v1383_v53 = vsub.f32 1.5, %v1382_v48 }
 0x2bc   : > { %v1243_v31 = vsub.f32 %v1211_v47, %v1227_v57  ;;  %v1259_v57 = vsub.f32 %v2317_v7, %v2470_v36  ;;  %v1260_v36 = vsub.f32 %v2333_v26, %v2476_v21 }
 0x2bd   : > { %v1384_v61 = vmul.f32 %v1811_v27, %v1383_v53  ;;  %v1198_v3 = vpop.xlane.xlu0 %1197 }
 0x2be   : > { %v1813_v38 = vpop.eup %1812  ;;  %v2479_v34 = vadd.f32 1e-05, %v1243_v31  ;;  %v1214_v4 = vmul.f32 %v1198_v3, %v2060_v17 }
 0x2bf   : > { %v1390_v52 = vmul.f32 %v1813_v38, %v1274_v37  ;;  %v1134_v62 = vpop.xlane.xlu2 %1133  ;;  %v1194_v30 = vpop.xlane.xlu1 %1193  ;;  %v1388_v15 = vsel %vm1387_vm4, %v1811_v27, %v1384_v61  ;;  %vm1396_vm5 = vweird.f32 %v1813_v38 }
 0x2c0   : > { %v2484_v9 = vmul.f32 %v1134_v62, %v2060_v17  ;;  %v1212_v11 = vmul.f32 %v1194_v30, %v2060_v17  ;;  %v1449_v6 = vmul.f32 %v1388_v15, %v1257_v49  ;;  %1814 = vrsqrt.f32 %v2479_v34  ;;  %vm1397_vm7 = vmor %vm1395_vm6, %vm1396_vm5 }
 0x2c1   : > { %v1391_v16 = vmul.f32 %v1813_v38, %v1390_v52  ;;  %vm1405_vm10 = vweird.f32 %v2479_v34 }
 0x2c2   : > { %v1230_v25 = vmul.f32 %v2484_v9, %v2484_v9  ;;  %v1244_v44 = vsub.f32 %v1212_v11, %v1228_v8  ;;  %v1466_v41 = vmul.f32 %v2362_v45, %v1449_v6 }
 0x2c3   : > { %v1392_v14 = vmul.f32 0.5, %v1391_v16 }
 0x2c4   : > { %v1246_v55 = vsub.f32 %v1214_v4, %v1230_v25  ;;  %v2492_v40 = vadd.f32 1e-05, %v1244_v44  ;;  %v1483_v5 = vadd.f32 %v2370_v2, %v1466_v41  ;;  %v1262_v44 = vsub.f32 %v2343_v59, %v2484_v9 }
 0x2c5   : > { %v1393_v20 = vsub.f32 1.5, %v1392_v14 }
 0x2c6   : > { %v2498_v18 = vadd.f32 1e-05, %v1246_v55  ;;  %1816 = vrsqrt.f32 %v2492_v40  ;;  %v1499_v51 = vmax.f32 %v1483_v5, 0.0  ;;  %v1815_v35 = vpop.eup %1814  ;;  %vm1415_vm13 = vweird.f32 %v2492_v40 }
 0x2c7   : > { %v1394_v43 = vmul.f32 %v1813_v38, %v1393_v20  ;;  %v1196_v10 = vpop.xlane.xlu2 %1195  ;;  %v1400_v32 = vmul.f32 %v1815_v35, %v2479_v34  ;;  %vm1406_vm9 = vweird.f32 %v1815_v35 }
 0x2c8   : > { %1818 = vrsqrt.f32 %v2498_v18  ;;  %v1213_v28 = vmul.f32 %v1196_v10, %v2060_v17  ;;  %v1517_v24 = vmul.f32 %v2382_v50, %v1499_v51  ;;  %vm1407_vm11 = vmor %vm1405_vm10, %vm1406_vm9  ;;  %vm1435_vm15 = vweird.f32 %v2498_v18 }
 0x2c9   : > { %v1398_v60 = vsel %vm1397_vm7, %v1813_v38, %v1394_v43  ;;  %v1401_v54 = vmul.f32 %v1815_v35, %v1400_v32  ;;  %v1261_v10 = vsub.f32 %v2339_v13, %v2496_v23 }
 0x2ca   : > { %v1450_v33 = vmul.f32 %v1398_v60, %v1258_v58  ;;  %v1245_v56 = vsub.f32 %v1213_v28, %v1229_v29  ;;  %1543 = vadd.xlane.f32.xlu2 %v1517_v24 }
 0x2cb   : > { %v1402_v22 = vmul.f32 0.5, %v1401_v54 }
 0x2cc   : > { %v1817_v63 = vpop.eup %1816  ;;  %v1467_v27 = vmul.f32 %v2362_v45, %v1450_v33  ;;  %v2513_v19 = vadd.f32 1e-05, %v1245_v56  ;;  %v1524_v17 = vpop.xlane.xlu1 %1523 }
 0x2cd   : > { %v1410_v46 = vmul.f32 %v1817_v63, %v2492_v40  ;;  %v1403_v37 = vsub.f32 1.5, %v1402_v22  ;;  %v1557_v0 = vadd.f32 %v2509_v12, %v1524_v17  ;;  %vm1416_vm12 = vweird.f32 %v1817_v63 }
 0x2ce   : > { %v1819_v1 = vpop.eup %1818  ;;  %v1484_v42 = vadd.f32 %v2370_v2, %v1467_v27  ;;  %1820 = vrsqrt.f32 %v2513_v19  ;;  %vm1417_vm0 = vmor %vm1415_vm13, %vm1416_vm12  ;;  %vm1425_vm3 = vweird.f32 %v2513_v19 }
 0x2cf   : > { %v1430_v39 = vmul.f32 %v1819_v1, %v2498_v18  ;;  %v1411_v48 = vmul.f32 %v1817_v63, %v1410_v46  ;;  %v1404_v53 = vmul.f32 %v1815_v35, %v1403_v37  ;;  %1574 = vst.msk [vmem:[%s2519_s12] sm:$0xff] %vm1573_vm8, %v1557_v0  ;;  %vm1436_vm14 = vweird.f32 %v1819_v1 }
 0x2d0   : > { %v1500_v47 = vmax.f32 %v1484_v42, 0.0  ;;  %vm1437_vm1 = vmor %vm1435_vm15, %vm1436_vm14 }
 0x2d1   : > { %v1431_v61 = vmul.f32 %v1819_v1, %v1430_v39  ;;  %v1412_v31 = vmul.f32 0.5, %v1411_v48  ;;  %v1408_v38 = vsel %vm1407_vm11, %v1815_v35, %v1404_v53 }
 0x2d2   : > { %v1518_v49 = vmul.f32 %v2382_v50, %v1500_v47  ;;  %v1451_v3 = vmul.f32 %v1408_v38, %v1259_v57 }
 0x2d3   : > { %v1432_v52 = vmul.f32 0.5, %v1431_v61  ;;  %v1413_v62 = vsub.f32 1.5, %v1412_v31 }
 0x2d4   : > { %1545 = vadd.xlane.f32.xlu0 %v1518_v49  ;;  %v1821_v34 = vpop.eup %1820  ;;  %v1468_v7 = vmul.f32 %v2362_v45, %v1451_v3 }
 0x2d5   : > { %v1433_v30 = vsub.f32 1.5, %v1432_v52  ;;  %v1414_v15 = vmul.f32 %v1817_v63, %v1413_v62  ;;  %v1420_v8 = vmul.f32 %v1821_v34, %v2513_v19  ;;  %vm1426_vm2 = vweird.f32 %v1821_v34 }
 0x2d6   : > { %v1526_v11 = vpop.xlane.xlu2 %1525  ;;  %v1485_v4 = vadd.f32 %v2370_v2, %v1468_v7  ;;  %vm1427_vm4 = vmor %vm1425_vm3, %vm1426_vm2 }
 0x2d7   : > { %v1434_v6 = vmul.f32 %v1819_v1, %v1433_v30  ;;  %v1558_v16 = vadd.f32 %v2509_v12, %v1526_v11  ;;  %v1418_v25 = vsel %vm1417_vm0, %v1817_v63, %v1414_v15  ;;  %v1421_v41 = vmul.f32 %v1821_v34, %v1420_v8 }
 0x2d8   : > { %v1452_v14 = vmul.f32 %v1418_v25, %v1260_v36  ;;  %v1501_v26 = vmax.f32 %v1485_v4, 0.0 }
 0x2d9   : > { %v1438_v55 = vsel %vm1437_vm1, %v1819_v1, %v1434_v6  ;;  %1575 = vst.msk [vmem:[%s2519_s12 + $0x8] sm:$0xff] %vm1573_vm8, %v1558_v16  ;;  %v1422_v40 = vmul.f32 0.5, %v1421_v41 }
 0x2da   : > { %v1454_v21 = vmul.f32 %v1438_v55, %v1262_v44  ;;  %v1469_v5 = vmul.f32 %v2362_v45, %v1452_v14  ;;  %v1519_v20 = vmul.f32 %v2382_v50, %v1501_v26 }
 0x2db   : > { %v1423_v18 = vsub.f32 1.5, %v1422_v40 }
 0x2dc   : > { %v1486_v51 = vadd.f32 %v2370_v2, %v1469_v5  ;;  %v1471_v59 = vmul.f32 %v2362_v45, %v1454_v21  ;;  %1547 = vadd.xlane.f32.xlu1 %v1519_v20 }
 0x2dd   : > { %v1424_v9 = vmul.f32 %v1821_v34, %v1423_v18 }
 0x2de   : > { %v1502_v35 = vmax.f32 %v1486_v51, 0.0  ;;  %v1488_v43 = vadd.f32 %v2370_v2, %v1471_v59  ;;  %v1528_v58 = vpop.xlane.xlu0 %1527 }
 0x2df   : > { %v1559_v32 = vadd.f32 %v2509_v12, %v1528_v58  ;;  %v1428_v28 = vsel %vm1427_vm4, %v1821_v34, %v1424_v9 }
 0x2e0   : > { %v1520_v60 = vmul.f32 %v2382_v50, %v1502_v35  ;;  %v1504_v29 = vmax.f32 %v1488_v43, 0.0  ;;  %v1453_v24 = vmul.f32 %v1428_v28, %v1261_v10 }
 0x2e1   : > { %1576 = vst.msk [vmem:[%s2519_s12 + $0x10] sm:$0xff] %vm1573_vm8, %v1559_v32 }
 0x2e2   : > { %1549 = vadd.xlane.f32.xlu2 %v1520_v60  ;;  %v1522_v33 = vmul.f32 %v2382_v50, %v1504_v29  ;;  %v1470_v54 = vmul.f32 %v2362_v45, %v1453_v24 }
 0x2e4   : > { %1553 = vadd.xlane.f32.xlu1 %v1522_v33  ;;  %v1487_v13 = vadd.f32 %v2370_v2, %v1470_v54 }
 0x2e6   : > { %v1530_v23 = vpop.xlane.xlu1 %1529  ;;  %v1503_v63 = vmax.f32 %v1487_v13, 0.0 }
 0x2e7   : > { %v1560_v56 = vadd.f32 %v2509_v12, %v1530_v23 }
 0x2e8   : > { %v1521_v22 = vmul.f32 %v2382_v50, %v1503_v63 }
 0x2e9   : > { %1577 = vst.msk [vmem:[%s2519_s12 + $0x18] sm:$0xff] %vm1573_vm8, %v1560_v56 }
 0x2ea   : > { %1551 = vadd.xlane.f32.xlu0 %v1521_v22 }
 0x2ee   : > { %v1532_v27 = vpop.xlane.xlu2 %1531 }
 0x2ef   : > { %v1561_v46 = vadd.f32 %v2509_v12, %v1532_v27 }
 0x2f1   : > { %1578 = vst.msk [vmem:[%s2519_s12 + $0x20] sm:$0xff] %vm1573_vm8, %v1561_v46 }
 0x2f6   : > { %v1534_v45 = vpop.xlane.xlu0 %1533 }
 0x2f7   : > { %v1562_v2 = vadd.f32 %v2509_v12, %v1534_v45 }
 0x2f9   : > { %1579 = vst.msk [vmem:[%s2519_s12 + $0x28] sm:$0xff] %vm1573_vm8, %v1562_v2 }
 0x2fe   : > { %v1536_v19 = vpop.xlane.xlu1 %1535 }
 0x2ff   : > { %v1563_v17 = vadd.f32 %v2509_v12, %v1536_v19 }
 0x301   : > { %1580 = vst.msk [vmem:[%s2519_s12 + $0x30] sm:$0xff] %vm1573_vm8, %v1563_v17 }
 0x306   : > { %v1538_v50 = vpop.xlane.xlu2 %1537 }
 0x307   : > { %v1564_v1 = vadd.f32 %v2509_v12, %v1538_v50 }
 0x309   : > { %1581 = vst.msk [vmem:[%s2519_s12 + $0x38] sm:$0xff] %vm1573_vm8, %v1564_v1 }
 0x30e   : > { %v1540_v37 = vpop.xlane.xlu0 %1539 }
 0x30f   : > { %v1565_v0 = vadd.f32 %v2509_v12, %v1540_v37 }
 0x311   : > { %1582 = vst.msk [vmem:[%s2519_s12 + $0x40] sm:$0xff] %vm1573_vm8, %v1565_v0 }
 0x318   : > { %v1542_v42 = vpop.xlane.xlu1 %1541 }
 0x319   : > { %v1566_v39 = vadd.f32 %v2509_v12, %v1542_v42 }
 0x31b   : > { %1583 = vst.msk [vmem:[%s2519_s12 + $0x48] sm:$0xff] %vm1573_vm8, %v1566_v39 }
 0x33d   : > { %v1544_v48 = vpop.xlane.xlu2 %1543 }
 0x33e   : > { %v1567_v53 = vadd.f32 %v2509_v12, %v1544_v48 }
 0x340   : > { %1584 = vst.msk [vmem:[%s2519_s12 + $0x50] sm:$0xff] %vm1573_vm8, %v1567_v53 }
 0x347   : > { %v1546_v47 = vpop.xlane.xlu0 %1545 }
 0x348   : > { %v1568_v57 = vadd.f32 %v2509_v12, %v1546_v47 }
 0x34a   : > { %1585 = vst.msk [vmem:[%s2519_s12 + $0x58] sm:$0xff] %vm1573_vm8, %v1568_v57 }
 0x34f   : > { %v1548_v61 = vpop.xlane.xlu1 %1547 }
 0x350   : > { %v1569_v31 = vadd.f32 %v2509_v12, %v1548_v61 }
 0x352   : > { %1586 = vst.msk [vmem:[%s2519_s12 + $0x60] sm:$0xff] %vm1573_vm8, %v1569_v31 }
 0x355   : > { %v1550_v38 = vpop.xlane.xlu2 %1549 }
 0x356   : > { %v1570_v49 = vadd.f32 %v2509_v12, %v1550_v38 }
 0x357   : > { %v1554_v3 = vpop.xlane.xlu1 %1553 }
 0x358   : > { %1587 = vst.msk [vmem:[%s2519_s12 + $0x68] sm:$0xff] %vm1573_vm8, %v1570_v49  ;;  %v1572_v52 = vadd.f32 %v2509_v12, %v1554_v3 }
 0x35a   : > { %1589 = vst.msk [vmem:[%s2519_s12 + $0x78] sm:$0xff] %vm1573_vm8, %v1572_v52 }
 0x35d   : > { %v1552_v62 = vpop.xlane.xlu0 %1551 }
 0x35e   : > { %v1571_v34 = vadd.f32 %v2509_v12, %v1552_v62 }
 0x360   : > { %1588 = vst.msk [vmem:[%s2519_s12 + $0x70] sm:$0xff] %vm1573_vm8, %v1571_v34 }
 0x361 PF: > { %s19_s29 = sadd.s32 1, %s1828_s29  }
 0x362   : > { %p16_p4 = scmp.ge.s32.totalorder %s19_s29, 4  }
 0x364   :  { %18 = sbr.rel (!%p16_p4) target bundleno = 2 (0x2), region = 85 }

</bundles_post_ra>
